<compile_context>
chip_gen: v6e
topology: v6e:2x2x1
jax: 0.10.0
libtpu: 0.0.40
codegen_flags: <defaults>
</compile_context>

<pallas_src>
import functools
import math

import jax
import jax.numpy as jnp
from jax.experimental import pallas as pl
from jax.experimental.pallas import tpu as pltpu

_SQRT_HALF = 0.7071067811865476
_GELU_C = 0.7978845608028654  # sqrt(2/pi)


def _gelu(x):
    # tanh-approx GELU: one EUP tanh + a few VPU ops. |err| vs exact erf-GELU ~1e-3.
    return 0.5 * x * (1.0 + jnp.tanh(_GELU_C * (x + 0.044715 * x * x * x)))


def _layernorm(x, w, b, n, eps=1e-5):
    # nn.LayerNorm([n_tokens, n_channel]) on x: (Bblk, T, C_pad) — normalize jointly
    # over (T, C) PER EXAMPLE.  Padded channel lanes are exactly zero, so the fused
    # sum / sum-of-squares are correct when divided by the TRUE element count n.
    s = jnp.sum(jnp.sum(x, axis=2, keepdims=True), axis=1, keepdims=True)
    ss = jnp.sum(jnp.sum(x * x, axis=2, keepdims=True), axis=1, keepdims=True)
    mu = s * (1.0 / n)
    var = ss * (1.0 / n) - mu * mu
    return (x - mu) * jax.lax.rsqrt(var + eps) * w + b


def _mixer_kernel(x_ref, wp_ref, bp_ref,
                  tlnw_ref, tlnb_ref, tw1_ref, tb1_ref, tw2_ref, tb2_ref,
                  clnw_ref, clnb_ref, cw3_ref, cb3_ref, cw4_ref, cb4_ref,
                  olnw_ref, olnb_ref, ow_ref, ob_ref,
                  out_ref, x_acc, *, n_norm, c_true):
    f32 = jnp.float32
    bf16 = jnp.bfloat16
    Bblk, T, C = x_acc.shape          # C = lane-padded channel width
    l = pl.program_id(1)

    # ---- PerPatchMLP: once per batch block (layer step 0), batch fused into M dim ----
    @pl.when(l == 0)
    def _():
        p = x_ref[...].reshape(Bblk * T, x_ref.shape[-1])                 # (Bblk*T, n_pixels) bf16
        x0 = jnp.dot(p, wp_ref[...], preferred_element_type=f32) + bp_ref[...]
        x_acc[...] = x0.reshape(Bblk, T, C)

    x = x_acc[...]                                                        # (Bblk, T, C) f32

    # ---- TokenMixingMLP: single 2-D matmuls over the whole batch block --------------
    # Transpose tokens onto the contraction dim once (XLU), merge leading dims, then
    # (Bblk*C, T) @ (T, Hd) and (Bblk*C, Hd) @ (Hd, T): weights pushed into the MXU
    # once per layer step, lane-dense row biases, no per-example weight re-push.
    z = _layernorm(x, tlnw_ref[0].astype(f32), tlnb_ref[0].astype(f32), n_norm)
    zt = jnp.transpose(z, (0, 2, 1)).reshape(Bblk * C, T).astype(bf16)
    h = jnp.dot(zt, tw1_ref[0], preferred_element_type=f32) + tb1_ref[0]  # (Bblk*C, Hd)
    h = _gelu(h).astype(bf16)
    r = jnp.dot(h, tw2_ref[0], preferred_element_type=f32) + tb2_ref[0]   # (Bblk*C, T)
    r = jnp.transpose(r.reshape(Bblk, C, T), (0, 2, 1))                   # (Bblk, T, C)
    if c_true < C:
        # mlp1/mlp2 biases leak into the zero-padded channel lanes; keep them exactly 0
        # so later LayerNorm statistics stay correct.
        lane = jax.lax.broadcasted_iota(jnp.int32, (1, 1, C), 2)
        r = jnp.where(lane < c_true, r, 0.0)
    x = x + r

    # ---- ChannelMixingMLP: batch+tokens fused into the matmul M dim ------------------
    z = _layernorm(x, clnw_ref[0].astype(f32), clnb_ref[0].astype(f32), n_norm)
    z = z.reshape(Bblk * T, C).astype(bf16)
    h = _gelu(jnp.dot(z, cw3_ref[0], preferred_element_type=f32) + cb3_ref[0])
    r = jnp.dot(h.astype(bf16), cw4_ref[0], preferred_element_type=f32) + cb4_ref[0]
    x = x + r.reshape(Bblk, T, C)

    x_acc[...] = x

    # ---- OutputMLP: once per batch block (last layer step) ---------------------------
    @pl.when(l == pl.num_programs(1) - 1)
    def _():
        zo = _layernorm(x, olnw_ref[...], olnb_ref[...], n_norm)
        m = jnp.mean(zo, axis=1)                                          # (Bblk, C)
        out_ref[...] = (jnp.dot(m.astype(bf16), ow_ref[...],
                                preferred_element_type=f32) + ob_ref[...])


def _image_to_patches(x_img, patch_size):
    P = patch_size
    B, C, H, W = x_img.shape
    x = x_img.reshape(B, C, H // P, P, W // P, P)
    x = jnp.transpose(x, (0, 2, 4, 1, 3, 5))
    return x.reshape(B, (H // P) * (W // P), C * P * P)


_LAYER_PARAMS = ("tlnw", "tlnb", "tw1", "tb1", "tw2", "tb2",
                 "clnw", "clnb", "cw3", "cb3", "cw4", "cb4")
# bf16: all MXU weights + the per-layer LN affines (streamed every layer step).
_BF16_PARAMS = ("wp", "tw1", "tw2", "cw3", "cw4", "ow", "tlnw", "tlnb", "clnw", "clnb")


def _round_up(v, m):
    return ((v + m - 1) // m) * m


def _pad_axes(a, pads):
    width = [(0, 0)] * a.ndim
    for ax, tgt in pads.items():
        width[ax] = (0, tgt - a.shape[ax])
    if all(w == (0, 0) for w in width):
        return a
    return jnp.pad(a, width)


def _choose_block_b(B, block_b):
    # Bblk must be a multiple of 8 (output-block sublane alignment) unless it covers
    # the whole padded batch.  For mid-sized batches force >=2 batch blocks so the
    # "parallel" axis can shard across both TensorCores on v7x.
    if B > block_b:
        return max(8, (block_b // 8) * 8)
    if B >= 16:
        half = -(-B // 2)
        return -(-half // 8) * 8
    return B


def mlp_mixer_pallas(x_img, params, *, patch_size, n_layers, block_b=64):
    # block_b is a per-generation tuning knob: bigger Bblk amortizes per-layer weight
    # DMA (weights are re-streamed once per batch block).  v6e: keep Bblk*T a multiple
    # of 256; v7x: roughly halve it (64 MiB VMEM) and keep >=2 batch blocks.
    patches = _image_to_patches(x_img, patch_size)
    B, T, n_pixels = patches.shape
    C = params["wp"].shape[1]
    Hd = params["cw3"].shape[2]
    O = params["ow"].shape[1]
    Cp, Hp, Op = _round_up(C, 128), _round_up(Hd, 128), _round_up(O, 128)

    Bblk = _choose_block_b(B, block_b)
    B_pad = pl.cdiv(B, Bblk) * Bblk
    if B_pad != B:
        patches = jnp.pad(patches, ((0, B_pad - B), (0, 0), (0, 0)))
    patches = patches.astype(jnp.bfloat16)

    # Zero-pad lane axes to 128 multiples (lane-dense VPU/MXU/vector stores); cast
    # matmul weights + per-layer LN affines to bf16, keep biases / output LN in f32.
    pads = {
        "wp": {1: Cp}, "bp": {1: Cp},
        "tlnw": {2: Cp}, "tlnb": {2: Cp},
        "tw1": {2: Hp}, "tb1": {2: Hp}, "tw2": {1: Hp}, "tb2": {},
        "clnw": {2: Cp}, "clnb": {2: Cp},
        "cw3": {1: Cp, 2: Hp}, "cb3": {2: Hp}, "cw4": {1: Hp, 2: Cp}, "cb4": {2: Cp},
        "olnw": {1: Cp}, "olnb": {1: Cp}, "ow": {0: Cp, 1: Op}, "ob": {1: Op},
    }
    p = {}
    for k, v in params.items():
        a = _pad_axes(v, pads[k])
        p[k] = a.astype(jnp.bfloat16) if k in _BF16_PARAMS else a.astype(jnp.float32)

    def layer_spec(arr):       # stream one layer per step along grid axis 1
        rest = arr.shape[1:]
        nd = len(rest)
        return pl.BlockSpec((1,) + rest, lambda b, l, _n=nd: (l,) + (0,) * _n)

    def const_spec(arr):       # invariant params stay resident
        nd = arr.ndim
        return pl.BlockSpec(arr.shape, lambda b, l, _n=nd: (0,) * _n)

    ordered_names = ["wp", "bp"] + list(_LAYER_PARAMS) + ["olnw", "olnb", "ow", "ob"]
    ordered = [p[k] for k in ordered_names]
    in_specs = [pl.BlockSpec((Bblk, T, n_pixels), lambda b, l: (b, 0, 0))]
    in_specs += [layer_spec(a) if n in _LAYER_PARAMS else const_spec(a)
                 for n, a in zip(ordered_names, ordered)]

    # Explicit VMEM budget: double-buffered param/activation blocks + scratch + a
    # headroom term for live f32 intermediates; capped at v7x's 64 MiB physical VMEM.
    def _blk_bytes(name, arr):
        shp = arr.shape[1:] if name in _LAYER_PARAMS else arr.shape
        return math.prod(shp) * arr.dtype.itemsize
    est = sum(2 * _blk_bytes(n, a) for n, a in zip(ordered_names, ordered))
    est += 2 * Bblk * T * n_pixels * 2          # patches block (bf16, double-buffered)
    est += 2 * Bblk * Op * 4                    # output block
    est += Bblk * T * Cp * 4                    # x_acc scratch
    est += 6 * Bblk * Cp * max(Hp, T) * 4       # live intermediates headroom
    vmem_limit = int(min(max(2 * est, 32 * 1024 * 1024), 64 * 1024 * 1024))

    kernel = functools.partial(_mixer_kernel, n_norm=float(T * C), c_true=int(C))
    out = pl.pallas_call(
        kernel,
        out_shape=jax.ShapeDtypeStruct((B_pad, Op), jnp.float32),
        grid=(B_pad // Bblk, n_layers),
        in_specs=in_specs,
        out_specs=pl.BlockSpec((Bblk, Op), lambda b, l: (b, 0)),
        scratch_shapes=[pltpu.VMEM((Bblk, T, Cp), jnp.float32)],
        compiler_params=pltpu.CompilerParams(
            dimension_semantics=("parallel", "arbitrary"),
            vmem_limit_bytes=vmem_limit),
    )(patches, *ordered)
    return out[:B, :O]


def mixer_reference(x_img, params, *, patch_size, n_layers):
    # Pure-JAX f32 reference mirroring the PyTorch forward pass (exact erf GELU).
    x = _image_to_patches(x_img, patch_size)
    x = x @ params["wp"] + params["bp"]

    def ln(v, w, b, eps=1e-5):
        mu = jnp.mean(v, axis=(-2, -1), keepdims=True)
        var = jnp.mean((v - mu) ** 2, axis=(-2, -1), keepdims=True)
        return (v - mu) / jnp.sqrt(var + eps) * w + b

    gelu = lambda v: 0.5 * v * (1.0 + jax.scipy.special.erf(v * _SQRT_HALF))

    for l in range(n_layers):
        z = ln(x, params["tlnw"][l], params["tlnb"][l])
        zt = jnp.swapaxes(z, 1, 2)                              # (B, C, T)
        h = gelu(zt @ params["tw1"][l] + params["tb1"][l])      # (B, C, Hd)
        r = h @ params["tw2"][l] + params["tb2"][l]             # (B, C, T)
        x = x + jnp.swapaxes(r, 1, 2)
        z = ln(x, params["clnw"][l], params["clnb"][l])
        h = gelu(z @ params["cw3"][l] + params["cb3"][l])
        x = x + (h @ params["cw4"][l] + params["cb4"][l])
    z = ln(x, params["olnw"], params["olnb"])
    m = jnp.mean(z, axis=1)
    return m @ params["ow"] + params["ob"]


def init_params(key, *, n_layers, n_tokens, n_pixels, n_channel, n_hidden, n_output):
    L, T, C, Hd, O = n_layers, n_tokens, n_channel, n_hidden, n_output
    keys = jax.random.split(key, 12)

    def lin(k, fan_in, shape):
        bound = 1.0 / float(fan_in) ** 0.5
        return jax.random.uniform(k, shape, jnp.float32, -bound, bound)

    return dict(
        # PerPatchMLP Linear(n_pixels -> C), stored (in, out); lane-dense bias (1, C).
        wp=lin(keys[0], n_pixels, (n_pixels, C)),
        bp=lin(keys[1], n_pixels, (1, C)),
        # TokenMixing: LN affine (torch defaults), mlp1 stored transposed (T, Hd) with
        # lane-dense row bias (1, Hd); mlp2 stored (Hd, T) with row bias (1, T).
        tlnw=jnp.ones((L, T, C), jnp.float32),
        tlnb=jnp.zeros((L, T, C), jnp.float32),
        tw1=lin(keys[2], T, (L, T, Hd)),
        tb1=lin(keys[3], T, (L, 1, Hd)),
        tw2=lin(keys[4], Hd, (L, Hd, T)),
        tb2=lin(keys[5], Hd, (L, 1, T)),
        # ChannelMixing: mlp3 (C -> Hd), mlp4 (Hd -> C), stored (in, out); lane-dense biases.
        clnw=jnp.ones((L, T, C), jnp.float32),
        clnb=jnp.zeros((L, T, C), jnp.float32),
        cw3=lin(keys[6], C, (L, C, Hd)),
        cb3=lin(keys[7], C, (L, 1, Hd)),
        cw4=lin(keys[8], Hd, (L, Hd, C)),
        cb4=lin(keys[9], Hd, (L, 1, C)),
        # OutputMLP
        olnw=jnp.ones((T, C), jnp.float32),
        olnb=jnp.zeros((T, C), jnp.float32),
        ow=lin(keys[10], C, (C, O)),
        ob=lin(keys[11], C, (1, O)),
    )


if __name__ == "__main__":
    # Small shapes consistent with the module's constructor.
    n_layers = 2
    patch_size = 4
    image_h = image_w = 16
    n_image_channel = 3
    n_channel = 32
    n_hidden = 64
    n_output = 8
    batch = 2

    n_tokens = (image_h // patch_size) * (image_w // patch_size)   # 16
    n_pixels = n_image_channel * patch_size ** 2                   # 48

    key = jax.random.PRNGKey(0)
    kx, kp = jax.random.split(key)
    x = jax.random.normal(kx, (batch, n_image_channel, image_h, image_w), jnp.float32)
    params = init_params(kp, n_layers=n_layers, n_tokens=n_tokens, n_pixels=n_pixels,
                         n_channel=n_channel, n_hidden=n_hidden, n_output=n_output)

    y = mlp_mixer_pallas(x, params, patch_size=patch_size, n_layers=n_layers)
    y = jax.block_until_ready(y)

    y_ref = mixer_reference(x, params, patch_size=patch_size, n_layers=n_layers)
    assert y.shape == (batch, n_output), y.shape
    assert jnp.allclose(y, y_ref, atol=2e-2, rtol=2e-2), (y, y_ref)

    print("KERNEL_OK")
</pallas_src>

<mosaic_0001>
module attributes {stable_mosaic.version = 11 : i64} {
  func.func @_mixer_kernel(%arg0: i32, %arg1: i32, %arg2: memref<2x16x48xbf16, #tpu.memory_space<vmem>>, %arg3: memref<48x128xbf16, #tpu.memory_space<vmem>>, %arg4: memref<1x128xf32, #tpu.memory_space<vmem>>, %arg5: memref<1x16x128xbf16, #tpu.memory_space<vmem>>, %arg6: memref<1x16x128xbf16, #tpu.memory_space<vmem>>, %arg7: memref<1x16x128xbf16, #tpu.memory_space<vmem>>, %arg8: memref<1x1x128xf32, #tpu.memory_space<vmem>>, %arg9: memref<1x128x16xbf16, #tpu.memory_space<vmem>>, %arg10: memref<1x1x16xf32, #tpu.memory_space<vmem>>, %arg11: memref<1x16x128xbf16, #tpu.memory_space<vmem>>, %arg12: memref<1x16x128xbf16, #tpu.memory_space<vmem>>, %arg13: memref<1x128x128xbf16, #tpu.memory_space<vmem>>, %arg14: memref<1x1x128xf32, #tpu.memory_space<vmem>>, %arg15: memref<1x128x128xbf16, #tpu.memory_space<vmem>>, %arg16: memref<1x1x128xf32, #tpu.memory_space<vmem>>, %arg17: memref<16x128xf32, #tpu.memory_space<vmem>>, %arg18: memref<16x128xf32, #tpu.memory_space<vmem>>, %arg19: memref<128x128xbf16, #tpu.memory_space<vmem>>, %arg20: memref<1x128xf32, #tpu.memory_space<vmem>>, %arg21: memref<2x128xf32, #tpu.memory_space<vmem>>, %arg22: memref<2x16x128xf32, #tpu.memory_space<vmem>>) attributes {dimension_semantics = [#tpu.dimension_semantics<parallel>, #tpu.dimension_semantics<arbitrary>], iteration_bounds = array<i64: 1, 2>, scalar_prefetch = 0 : i64, scratch_operands = 1 : i64, tpu.core_type = #tpu.core_type<tc>, window_params = [{transform_indices = @transform_0, window_bounds = array<i64: 2, 16, 48>}, {pipeline_mode = #tpu.pipeline_mode<synchronous>, transform_indices = @transform_1, window_bounds = array<i64: 48, 128>}, {pipeline_mode = #tpu.pipeline_mode<synchronous>, transform_indices = @transform_2, window_bounds = array<i64: 1, 128>}, {transform_indices = @transform_3, window_bounds = array<i64: 1, 16, 128>}, {transform_indices = @transform_4, window_bounds = array<i64: 1, 16, 128>}, {transform_indices = @transform_5, window_bounds = array<i64: 1, 16, 128>}, {transform_indices = @transform_6, window_bounds = array<i64: 1, 1, 128>}, {transform_indices = @transform_7, window_bounds = array<i64: 1, 128, 16>}, {transform_indices = @transform_8, window_bounds = array<i64: 1, 1, 16>}, {transform_indices = @transform_9, window_bounds = array<i64: 1, 16, 128>}, {transform_indices = @transform_10, window_bounds = array<i64: 1, 16, 128>}, {transform_indices = @transform_11, window_bounds = array<i64: 1, 128, 128>}, {transform_indices = @transform_12, window_bounds = array<i64: 1, 1, 128>}, {transform_indices = @transform_13, window_bounds = array<i64: 1, 128, 128>}, {transform_indices = @transform_14, window_bounds = array<i64: 1, 1, 128>}, {pipeline_mode = #tpu.pipeline_mode<synchronous>, transform_indices = @transform_15, window_bounds = array<i64: 16, 128>}, {pipeline_mode = #tpu.pipeline_mode<synchronous>, transform_indices = @transform_16, window_bounds = array<i64: 16, 128>}, {pipeline_mode = #tpu.pipeline_mode<synchronous>, transform_indices = @transform_17, window_bounds = array<i64: 128, 128>}, {pipeline_mode = #tpu.pipeline_mode<synchronous>, transform_indices = @transform_18, window_bounds = array<i64: 1, 128>}, {transform_indices = @transform_19, window_bounds = array<i64: 2, 128>}]} {
    %c0_i32 = arith.constant 0 : i32
    %0 = arith.cmpi eq, %arg1, %c0_i32 : i32
    %1 = arith.extui %0 : i1 to i32
    %c0_i32_0 = arith.constant 0 : i32
    %2 = arith.cmpi ne, %1, %c0_i32_0 : i32
    scf.if %2 {
      %c0_69 = arith.constant 0 : index
      %c0_70 = arith.constant 0 : index
      %c0_71 = arith.constant 0 : index
      %149 = vector.load %arg2[%c0_69, %c0_70, %c0_71] : memref<2x16x48xbf16, #tpu.memory_space<vmem>>, vector<2x16x48xbf16>
      %150 = vector.shape_cast %149 : vector<2x16x48xbf16> to vector<32x48xbf16>
      %c0_72 = arith.constant 0 : index
      %c0_73 = arith.constant 0 : index
      %151 = vector.load %arg3[%c0_72, %c0_73] : memref<48x128xbf16, #tpu.memory_space<vmem>>, vector<48x128xbf16>
      %cst_74 = arith.constant dense<0.000000e+00> : vector<32x128xf32>
      %152 = tpu.matmul %150, %151, %cst_74 {dimension_numbers = #tpu.dot_dimension_numbers<[1], [0], [0], [1], [0, 0, 1, 1], [], []>} : vector<32x48xbf16>, vector<48x128xbf16>, vector<32x128xf32> -> vector<32x128xf32>
      %c0_75 = arith.constant 0 : index
      %c0_76 = arith.constant 0 : index
      %153 = vector.load %arg4[%c0_75, %c0_76] : memref<1x128xf32, #tpu.memory_space<vmem>>, vector<1x128xf32>
      %154 = vector.broadcast %153 : vector<1x128xf32> to vector<32x128xf32>
      %155 = arith.addf %152, %154 : vector<32x128xf32>
      %156 = vector.shape_cast %155 : vector<32x128xf32> to vector<2x16x128xf32>
      %c0_77 = arith.constant 0 : index
      %c0_78 = arith.constant 0 : index
      %c0_79 = arith.constant 0 : index
      %157 = vector.load %arg22[%c0_77, %c0_78, %c0_79] : memref<2x16x128xf32, #tpu.memory_space<vmem>>, vector<2x16x128xf32>
      tpu.vector_store %arg22[%c0_77, %c0_78, %c0_79], %156 {strides = array<i32>} : memref<2x16x128xf32, #tpu.memory_space<vmem>>, vector<2x16x128xf32>,
    } else {
    }
    %c0 = arith.constant 0 : index
    %c0_1 = arith.constant 0 : index
    %c0_2 = arith.constant 0 : index
    %3 = vector.load %arg22[%c0, %c0_1, %c0_2] : memref<2x16x128xf32, #tpu.memory_space<vmem>>, vector<2x16x128xf32>
    %c0_3 = arith.constant 0 : index
    %c0_4 = arith.constant 0 : index
    %c0_5 = arith.constant 0 : index
    %4 = vector.load %arg5[%c0_3, %c0_4, %c0_5] : memref<1x16x128xbf16, #tpu.memory_space<vmem>>, vector<1x16x128xbf16>
    %5 = vector.shape_cast %4 : vector<1x16x128xbf16> to vector<16x128xbf16>
    %6 = arith.extf %5 : vector<16x128xbf16> to vector<16x128xf32>
    %c0_6 = arith.constant 0 : index
    %c0_7 = arith.constant 0 : index
    %c0_8 = arith.constant 0 : index
    %7 = vector.load %arg6[%c0_6, %c0_7, %c0_8] : memref<1x16x128xbf16, #tpu.memory_space<vmem>>, vector<1x16x128xbf16>
    %8 = vector.shape_cast %7 : vector<1x16x128xbf16> to vector<16x128xbf16>
    %9 = arith.extf %8 : vector<16x128xbf16> to vector<16x128xf32>
    %cst = arith.constant dense<0.000000e+00> : vector<2x16xf32>
    %10 = vector.multi_reduction <add>, %3, %cst [2] : vector<2x16x128xf32> to vector<2x16xf32>
    %11 = vector.shape_cast %10 : vector<2x16xf32> to vector<2x16x1xf32>
    %cst_9 = arith.constant dense<0.000000e+00> : vector<2x1xf32>
    %12 = vector.multi_reduction <add>, %11, %cst_9 [1] : vector<2x16x1xf32> to vector<2x1xf32>
    %13 = vector.shape_cast %12 : vector<2x1xf32> to vector<2x1x1xf32>
    %14 = arith.mulf %3, %3 : vector<2x16x128xf32>
    %cst_10 = arith.constant dense<0.000000e+00> : vector<2x16xf32>
    %15 = vector.multi_reduction <add>, %14, %cst_10 [2] : vector<2x16x128xf32> to vector<2x16xf32>
    %16 = vector.shape_cast %15 : vector<2x16xf32> to vector<2x16x1xf32>
    %cst_11 = arith.constant dense<0.000000e+00> : vector<2x1xf32>
    %17 = vector.multi_reduction <add>, %16, %cst_11 [1] : vector<2x16x1xf32> to vector<2x1xf32>
    %18 = vector.shape_cast %17 : vector<2x1xf32> to vector<2x1x1xf32>
    %cst_12 = arith.constant 0.001953125 : f32
    %19 = vector.broadcast %cst_12 : f32 to vector<2x1x1xf32>
    %20 = arith.mulf %13, %19 : vector<2x1x1xf32>
    %cst_13 = arith.constant 0.001953125 : f32
    %21 = vector.broadcast %cst_13 : f32 to vector<2x1x1xf32>
    %22 = arith.mulf %18, %21 : vector<2x1x1xf32>
    %23 = arith.mulf %20, %20 : vector<2x1x1xf32>
    %24 = arith.subf %22, %23 : vector<2x1x1xf32>
    %25 = vector.broadcast %20 : vector<2x1x1xf32> to vector<2x16x128xf32>
    %26 = arith.subf %3, %25 : vector<2x16x128xf32>
    %cst_14 = arith.constant 9.99999974E-6 : f32
    %27 = vector.broadcast %cst_14 : f32 to vector<2x1x1xf32>
    %28 = arith.addf %24, %27 : vector<2x1x1xf32>
    %29 = math.rsqrt %28 : vector<2x1x1xf32>
    %30 = vector.broadcast %29 : vector<2x1x1xf32> to vector<2x16x128xf32>
    %31 = arith.mulf %26, %30 : vector<2x16x128xf32>
    %32 = vector.shape_cast %6 : vector<16x128xf32> to vector<1x16x128xf32>
    %33 = vector.broadcast %32 : vector<1x16x128xf32> to vector<2x16x128xf32>
    %34 = arith.mulf %31, %33 : vector<2x16x128xf32>
    %35 = vector.shape_cast %9 : vector<16x128xf32> to vector<1x16x128xf32>
    %36 = vector.broadcast %35 : vector<1x16x128xf32> to vector<2x16x128xf32>
    %37 = arith.addf %34, %36 : vector<2x16x128xf32>
    %38 = tpu.transpose %37, [0, 2, 1] : vector<2x16x128xf32> -> vector<2x128x16xf32>
    %39 = vector.shape_cast %38 : vector<2x128x16xf32> to vector<256x16xf32>
    %40 = arith.truncf %39 : vector<256x16xf32> to vector<256x16xbf16>
    %c0_15 = arith.constant 0 : index
    %c0_16 = arith.constant 0 : index
    %c0_17 = arith.constant 0 : index
    %41 = vector.load %arg7[%c0_15, %c0_16, %c0_17] : memref<1x16x128xbf16, #tpu.memory_space<vmem>>, vector<1x16x128xbf16>
    %42 = vector.shape_cast %41 : vector<1x16x128xbf16> to vector<16x128xbf16>
    %cst_18 = arith.constant dense<0.000000e+00> : vector<256x128xf32>
    %43 = tpu.matmul %40, %42, %cst_18 {dimension_numbers = #tpu.dot_dimension_numbers<[1], [0], [0], [1], [0, 0, 1, 1], [], []>} : vector<256x16xbf16>, vector<16x128xbf16>, vector<256x128xf32> -> vector<256x128xf32>
    %c0_19 = arith.constant 0 : index
    %c0_20 = arith.constant 0 : index
    %c0_21 = arith.constant 0 : index
    %44 = vector.load %arg8[%c0_19, %c0_20, %c0_21] : memref<1x1x128xf32, #tpu.memory_space<vmem>>, vector<1x1x128xf32>
    %45 = vector.shape_cast %44 : vector<1x1x128xf32> to vector<1x128xf32>
    %46 = vector.broadcast %45 : vector<1x128xf32> to vector<256x128xf32>
    %47 = arith.addf %43, %46 : vector<256x128xf32>
    %cst_22 = arith.constant 5.000000e-01 : f32
    %48 = vector.broadcast %cst_22 : f32 to vector<256x128xf32>
    %49 = arith.mulf %48, %47 : vector<256x128xf32>
    %cst_23 = arith.constant 4.471500e-02 : f32
    %50 = vector.broadcast %cst_23 : f32 to vector<256x128xf32>
    %51 = arith.mulf %50, %47 : vector<256x128xf32>
    %52 = arith.mulf %51, %47 : vector<256x128xf32>
    %53 = arith.mulf %52, %47 : vector<256x128xf32>
    %54 = arith.addf %47, %53 : vector<256x128xf32>
    %cst_24 = arith.constant 0.797884583 : f32
    %55 = vector.broadcast %cst_24 : f32 to vector<256x128xf32>
    %56 = arith.mulf %55, %54 : vector<256x128xf32>
    %57 = math.tanh %56 : vector<256x128xf32>
    %cst_25 = arith.constant 1.000000e+00 : f32
    %58 = vector.broadcast %cst_25 : f32 to vector<256x128xf32>
    %59 = arith.addf %58, %57 : vector<256x128xf32>
    %60 = arith.mulf %49, %59 : vector<256x128xf32>
    %61 = arith.truncf %60 : vector<256x128xf32> to vector<256x128xbf16>
    %c0_26 = arith.constant 0 : index
    %c0_27 = arith.constant 0 : index
    %c0_28 = arith.constant 0 : index
    %62 = vector.load %arg9[%c0_26, %c0_27, %c0_28] : memref<1x128x16xbf16, #tpu.memory_space<vmem>>, vector<1x128x16xbf16>
    %63 = vector.shape_cast %62 : vector<1x128x16xbf16> to vector<128x16xbf16>
    %cst_29 = arith.constant dense<0.000000e+00> : vector<256x16xf32>
    %64 = tpu.matmul %61, %63, %cst_29 {dimension_numbers = #tpu.dot_dimension_numbers<[1], [0], [0], [1], [0, 0, 1, 1], [], []>} : vector<256x128xbf16>, vector<128x16xbf16>, vector<256x16xf32> -> vector<256x16xf32>
    %c0_30 = arith.constant 0 : index
    %c0_31 = arith.constant 0 : index
    %c0_32 = arith.constant 0 : index
    %65 = vector.load %arg10[%c0_30, %c0_31, %c0_32] : memref<1x1x16xf32, #tpu.memory_space<vmem>>, vector<1x1x16xf32>
    %66 = vector.shape_cast %65 : vector<1x1x16xf32> to vector<1x16xf32>
    %67 = vector.broadcast %66 : vector<1x16xf32> to vector<256x16xf32>
    %68 = arith.addf %64, %67 : vector<256x16xf32>
    %69 = vector.shape_cast %68 : vector<256x16xf32> to vector<2x128x16xf32>
    %70 = tpu.transpose %69, [0, 2, 1] : vector<2x128x16xf32> -> vector<2x16x128xf32>
    %71 = tpu.iota {dimensions = array<i32: 2>} : vector<1x1x128xi32>
    %c32_i32 = arith.constant 32 : i32
    %72 = vector.broadcast %c32_i32 : i32 to vector<1x1x128xi32>
    %73 = arith.cmpi slt, %71, %72 : vector<1x1x128xi32>
    %cst_33 = arith.constant 0.000000e+00 : f32
    %74 = vector.shape_cast %73 : vector<1x1x128xi1> to vector<1x1x128xi1>
    %75 = vector.broadcast %74 : vector<1x1x128xi1> to vector<2x16x128xi1>
    %76 = vector.broadcast %cst_33 : f32 to vector<2x16x128xf32>
    %77 = arith.select %75, %70, %76 : vector<2x16x128xi1>, vector<2x16x128xf32>
    %78 = arith.addf %3, %77 : vector<2x16x128xf32>
    %c0_34 = arith.constant 0 : index
    %c0_35 = arith.constant 0 : index
    %c0_36 = arith.constant 0 : index
    %79 = vector.load %arg11[%c0_34, %c0_35, %c0_36] : memref<1x16x128xbf16, #tpu.memory_space<vmem>>, vector<1x16x128xbf16>
    %80 = vector.shape_cast %79 : vector<1x16x128xbf16> to vector<16x128xbf16>
    %81 = arith.extf %80 : vector<16x128xbf16> to vector<16x128xf32>
    %c0_37 = arith.constant 0 : index
    %c0_38 = arith.constant 0 : index
    %c0_39 = arith.constant 0 : index
    %82 = vector.load %arg12[%c0_37, %c0_38, %c0_39] : memref<1x16x128xbf16, #tpu.memory_space<vmem>>, vector<1x16x128xbf16>
    %83 = vector.shape_cast %82 : vector<1x16x128xbf16> to vector<16x128xbf16>
    %84 = arith.extf %83 : vector<16x128xbf16> to vector<16x128xf32>
    %cst_40 = arith.constant dense<0.000000e+00> : vector<2x16xf32>
    %85 = vector.multi_reduction <add>, %78, %cst_40 [2] : vector<2x16x128xf32> to vector<2x16xf32>
    %86 = vector.shape_cast %85 : vector<2x16xf32> to vector<2x16x1xf32>
    %cst_41 = arith.constant dense<0.000000e+00> : vector<2x1xf32>
    %87 = vector.multi_reduction <add>, %86, %cst_41 [1] : vector<2x16x1xf32> to vector<2x1xf32>
    %88 = vector.shape_cast %87 : vector<2x1xf32> to vector<2x1x1xf32>
    %89 = arith.mulf %78, %78 : vector<2x16x128xf32>
    %cst_42 = arith.constant dense<0.000000e+00> : vector<2x16xf32>
    %90 = vector.multi_reduction <add>, %89, %cst_42 [2] : vector<2x16x128xf32> to vector<2x16xf32>
    %91 = vector.shape_cast %90 : vector<2x16xf32> to vector<2x16x1xf32>
    %cst_43 = arith.constant dense<0.000000e+00> : vector<2x1xf32>
    %92 = vector.multi_reduction <add>, %91, %cst_43 [1] : vector<2x16x1xf32> to vector<2x1xf32>
    %93 = vector.shape_cast %92 : vector<2x1xf32> to vector<2x1x1xf32>
    %cst_44 = arith.constant 0.001953125 : f32
    %94 = vector.broadcast %cst_44 : f32 to vector<2x1x1xf32>
    %95 = arith.mulf %88, %94 : vector<2x1x1xf32>
    %cst_45 = arith.constant 0.001953125 : f32
    %96 = vector.broadcast %cst_45 : f32 to vector<2x1x1xf32>
    %97 = arith.mulf %93, %96 : vector<2x1x1xf32>
    %98 = arith.mulf %95, %95 : vector<2x1x1xf32>
    %99 = arith.subf %97, %98 : vector<2x1x1xf32>
    %100 = vector.broadcast %95 : vector<2x1x1xf32> to vector<2x16x128xf32>
    %101 = arith.subf %78, %100 : vector<2x16x128xf32>
    %cst_46 = arith.constant 9.99999974E-6 : f32
    %102 = vector.broadcast %cst_46 : f32 to vector<2x1x1xf32>
    %103 = arith.addf %99, %102 : vector<2x1x1xf32>
    %104 = math.rsqrt %103 : vector<2x1x1xf32>
    %105 = vector.broadcast %104 : vector<2x1x1xf32> to vector<2x16x128xf32>
    %106 = arith.mulf %101, %105 : vector<2x16x128xf32>
    %107 = vector.shape_cast %81 : vector<16x128xf32> to vector<1x16x128xf32>
    %108 = vector.broadcast %107 : vector<1x16x128xf32> to vector<2x16x128xf32>
    %109 = arith.mulf %106, %108 : vector<2x16x128xf32>
    %110 = vector.shape_cast %84 : vector<16x128xf32> to vector<1x16x128xf32>
    %111 = vector.broadcast %110 : vector<1x16x128xf32> to vector<2x16x128xf32>
    %112 = arith.addf %109, %111 : vector<2x16x128xf32>
    %113 = vector.shape_cast %112 : vector<2x16x128xf32> to vector<32x128xf32>
    %114 = arith.truncf %113 : vector<32x128xf32> to vector<32x128xbf16>
    %c0_47 = arith.constant 0 : index
    %c0_48 = arith.constant 0 : index
    %c0_49 = arith.constant 0 : index
    %115 = vector.load %arg13[%c0_47, %c0_48, %c0_49] : memref<1x128x128xbf16, #tpu.memory_space<vmem>>, vector<1x128x128xbf16>
    %116 = vector.shape_cast %115 : vector<1x128x128xbf16> to vector<128x128xbf16>
    %cst_50 = arith.constant dense<0.000000e+00> : vector<32x128xf32>
    %117 = tpu.matmul %114, %116, %cst_50 {dimension_numbers = #tpu.dot_dimension_numbers<[1], [0], [0], [1], [0, 0, 1, 1], [], []>} : vector<32x128xbf16>, vector<128x128xbf16>, vector<32x128xf32> -> vector<32x128xf32>
    %c0_51 = arith.constant 0 : index
    %c0_52 = arith.constant 0 : index
    %c0_53 = arith.constant 0 : index
    %118 = vector.load %arg14[%c0_51, %c0_52, %c0_53] : memref<1x1x128xf32, #tpu.memory_space<vmem>>, vector<1x1x128xf32>
    %119 = vector.shape_cast %118 : vector<1x1x128xf32> to vector<1x128xf32>
    %120 = vector.broadcast %119 : vector<1x128xf32> to vector<32x128xf32>
    %121 = arith.addf %117, %120 : vector<32x128xf32>
    %cst_54 = arith.constant 5.000000e-01 : f32
    %122 = vector.broadcast %cst_54 : f32 to vector<32x128xf32>
    %123 = arith.mulf %122, %121 : vector<32x128xf32>
    %cst_55 = arith.constant 4.471500e-02 : f32
    %124 = vector.broadcast %cst_55 : f32 to vector<32x128xf32>
    %125 = arith.mulf %124, %121 : vector<32x128xf32>
    %126 = arith.mulf %125, %121 : vector<32x128xf32>
    %127 = arith.mulf %126, %121 : vector<32x128xf32>
    %128 = arith.addf %121, %127 : vector<32x128xf32>
    %cst_56 = arith.constant 0.797884583 : f32
    %129 = vector.broadcast %cst_56 : f32 to vector<32x128xf32>
    %130 = arith.mulf %129, %128 : vector<32x128xf32>
    %131 = math.tanh %130 : vector<32x128xf32>
    %cst_57 = arith.constant 1.000000e+00 : f32
    %132 = vector.broadcast %cst_57 : f32 to vector<32x128xf32>
    %133 = arith.addf %132, %131 : vector<32x128xf32>
    %134 = arith.mulf %123, %133 : vector<32x128xf32>
    %135 = arith.truncf %134 : vector<32x128xf32> to vector<32x128xbf16>
    %c0_58 = arith.constant 0 : index
    %c0_59 = arith.constant 0 : index
    %c0_60 = arith.constant 0 : index
    %136 = vector.load %arg15[%c0_58, %c0_59, %c0_60] : memref<1x128x128xbf16, #tpu.memory_space<vmem>>, vector<1x128x128xbf16>
    %137 = vector.shape_cast %136 : vector<1x128x128xbf16> to vector<128x128xbf16>
    %cst_61 = arith.constant dense<0.000000e+00> : vector<32x128xf32>
    %138 = tpu.matmul %135, %137, %cst_61 {dimension_numbers = #tpu.dot_dimension_numbers<[1], [0], [0], [1], [0, 0, 1, 1], [], []>} : vector<32x128xbf16>, vector<128x128xbf16>, vector<32x128xf32> -> vector<32x128xf32>
    %c0_62 = arith.constant 0 : index
    %c0_63 = arith.constant 0 : index
    %c0_64 = arith.constant 0 : index
    %139 = vector.load %arg16[%c0_62, %c0_63, %c0_64] : memref<1x1x128xf32, #tpu.memory_space<vmem>>, vector<1x1x128xf32>
    %140 = vector.shape_cast %139 : vector<1x1x128xf32> to vector<1x128xf32>
    %141 = vector.broadcast %140 : vector<1x128xf32> to vector<32x128xf32>
    %142 = arith.addf %138, %141 : vector<32x128xf32>
    %143 = vector.shape_cast %142 : vector<32x128xf32> to vector<2x16x128xf32>
    %144 = arith.addf %78, %143 : vector<2x16x128xf32>
    %c0_65 = arith.constant 0 : index
    %c0_66 = arith.constant 0 : index
    %c0_67 = arith.constant 0 : index
    %145 = vector.load %arg22[%c0_65, %c0_66, %c0_67] : memref<2x16x128xf32, #tpu.memory_space<vmem>>, vector<2x16x128xf32>
    tpu.vector_store %arg22[%c0_65, %c0_66, %c0_67], %144 {strides = array<i32>} : memref<2x16x128xf32, #tpu.memory_space<vmem>>, vector<2x16x128xf32>,
    %c1_i32 = arith.constant 1 : i32
    %146 = arith.cmpi eq, %arg1, %c1_i32 : i32
    %147 = arith.extui %146 : i1 to i32
    %c0_i32_68 = arith.constant 0 : i32
    %148 = arith.cmpi ne, %147, %c0_i32_68 : i32
    scf.if %148 {
      %c0_69 = arith.constant 0 : index
      %c0_70 = arith.constant 0 : index
      %149 = vector.load %arg17[%c0_69, %c0_70] : memref<16x128xf32, #tpu.memory_space<vmem>>, vector<16x128xf32>
      %c0_71 = arith.constant 0 : index
      %c0_72 = arith.constant 0 : index
      %150 = vector.load %arg18[%c0_71, %c0_72] : memref<16x128xf32, #tpu.memory_space<vmem>>, vector<16x128xf32>
      %cst_73 = arith.constant dense<0.000000e+00> : vector<2x16xf32>
      %151 = vector.multi_reduction <add>, %144, %cst_73 [2] : vector<2x16x128xf32> to vector<2x16xf32>
      %152 = vector.shape_cast %151 : vector<2x16xf32> to vector<2x16x1xf32>
      %cst_74 = arith.constant dense<0.000000e+00> : vector<2x1xf32>
      %153 = vector.multi_reduction <add>, %152, %cst_74 [1] : vector<2x16x1xf32> to vector<2x1xf32>
      %154 = vector.shape_cast %153 : vector<2x1xf32> to vector<2x1x1xf32>
      %155 = arith.mulf %144, %144 : vector<2x16x128xf32>
      %cst_75 = arith.constant dense<0.000000e+00> : vector<2x16xf32>
      %156 = vector.multi_reduction <add>, %155, %cst_75 [2] : vector<2x16x128xf32> to vector<2x16xf32>
      %157 = vector.shape_cast %156 : vector<2x16xf32> to vector<2x16x1xf32>
      %cst_76 = arith.constant dense<0.000000e+00> : vector<2x1xf32>
      %158 = vector.multi_reduction <add>, %157, %cst_76 [1] : vector<2x16x1xf32> to vector<2x1xf32>
      %159 = vector.shape_cast %158 : vector<2x1xf32> to vector<2x1x1xf32>
      %cst_77 = arith.constant 0.001953125 : f32
      %160 = vector.broadcast %cst_77 : f32 to vector<2x1x1xf32>
      %161 = arith.mulf %154, %160 : vector<2x1x1xf32>
      %cst_78 = arith.constant 0.001953125 : f32
      %162 = vector.broadcast %cst_78 : f32 to vector<2x1x1xf32>
      %163 = arith.mulf %159, %162 : vector<2x1x1xf32>
      %164 = arith.mulf %161, %161 : vector<2x1x1xf32>
      %165 = arith.subf %163, %164 : vector<2x1x1xf32>
      %166 = vector.broadcast %161 : vector<2x1x1xf32> to vector<2x16x128xf32>
      %167 = arith.subf %144, %166 : vector<2x16x128xf32>
      %cst_79 = arith.constant 9.99999974E-6 : f32
      %168 = vector.broadcast %cst_79 : f32 to vector<2x1x1xf32>
      %169 = arith.addf %165, %168 : vector<2x1x1xf32>
      %170 = math.rsqrt %169 : vector<2x1x1xf32>
      %171 = vector.broadcast %170 : vector<2x1x1xf32> to vector<2x16x128xf32>
      %172 = arith.mulf %167, %171 : vector<2x16x128xf32>
      %173 = vector.shape_cast %149 : vector<16x128xf32> to vector<1x16x128xf32>
      %174 = vector.broadcast %173 : vector<1x16x128xf32> to vector<2x16x128xf32>
      %175 = arith.mulf %172, %174 : vector<2x16x128xf32>
      %176 = vector.shape_cast %150 : vector<16x128xf32> to vector<1x16x128xf32>
      %177 = vector.broadcast %176 : vector<1x16x128xf32> to vector<2x16x128xf32>
      %178 = arith.addf %175, %177 : vector<2x16x128xf32>
      %cst_80 = arith.constant dense<0.000000e+00> : vector<2x128xf32>
      %179 = vector.multi_reduction <add>, %178, %cst_80 [1] : vector<2x16x128xf32> to vector<2x128xf32>
      %cst_81 = arith.constant 1.600000e+01 : f32
      %180 = vector.broadcast %cst_81 : f32 to vector<2x128xf32>
      %181 = arith.divf %179, %180 : vector<2x128xf32>
      %182 = arith.truncf %181 : vector<2x128xf32> to vector<2x128xbf16>
      %c0_82 = arith.constant 0 : index
      %c0_83 = arith.constant 0 : index
      %183 = vector.load %arg19[%c0_82, %c0_83] : memref<128x128xbf16, #tpu.memory_space<vmem>>, vector<128x128xbf16>
      %cst_84 = arith.constant dense<0.000000e+00> : vector<2x128xf32>
      %184 = tpu.matmul %182, %183, %cst_84 {dimension_numbers = #tpu.dot_dimension_numbers<[1], [0], [0], [1], [0, 0, 1, 1], [], []>} : vector<2x128xbf16>, vector<128x128xbf16>, vector<2x128xf32> -> vector<2x128xf32>
      %c0_85 = arith.constant 0 : index
      %c0_86 = arith.constant 0 : index
      %185 = vector.load %arg20[%c0_85, %c0_86] : memref<1x128xf32, #tpu.memory_space<vmem>>, vector<1x128xf32>
      %186 = vector.broadcast %185 : vector<1x128xf32> to vector<2x128xf32>
      %187 = arith.addf %184, %186 : vector<2x128xf32>
      %c0_87 = arith.constant 0 : index
      %c0_88 = arith.constant 0 : index
      %188 = vector.load %arg21[%c0_87, %c0_88] : memref<2x128xf32, #tpu.memory_space<vmem>>, vector<2x128xf32>
      tpu.vector_store %arg21[%c0_87, %c0_88], %187 {strides = array<i32>} : memref<2x128xf32, #tpu.memory_space<vmem>>, vector<2x128xf32>,
    } else {
    }
    return
  }
  func.func @transform_0(%arg0: i32, %arg1: i32) -> (i32, i32, i32) {
    %c0_i32 = arith.constant 0 : i32
    %c0_i32_0 = arith.constant 0 : i32
    %c0_i32_1 = arith.constant 0 : i32
    return %arg0, %c0_i32, %c0_i32_0 : i32, i32, i32
  }
  func.func @transform_1(%arg0: i32, %arg1: i32) -> (i32, i32) {
    %c0_i32 = arith.constant 0 : i32
    %c0_i32_0 = arith.constant 0 : i32
    %c0_i32_1 = arith.constant 0 : i32
    return %c0_i32, %c0_i32_0 : i32, i32
  }
  func.func @transform_2(%arg0: i32, %arg1: i32) -> (i32, i32) {
    %c0_i32 = arith.constant 0 : i32
    %c0_i32_0 = arith.constant 0 : i32
    %c0_i32_1 = arith.constant 0 : i32
    return %c0_i32, %c0_i32_0 : i32, i32
  }
  func.func @transform_3(%arg0: i32, %arg1: i32) -> (i32, i32, i32) {
    %c0_i32 = arith.constant 0 : i32
    %c0_i32_0 = arith.constant 0 : i32
    %c0_i32_1 = arith.constant 0 : i32
    return %arg1, %c0_i32, %c0_i32_0 : i32, i32, i32
  }
  func.func @transform_4(%arg0: i32, %arg1: i32) -> (i32, i32, i32) {
    %c0_i32 = arith.constant 0 : i32
    %c0_i32_0 = arith.constant 0 : i32
    %c0_i32_1 = arith.constant 0 : i32
    return %arg1, %c0_i32, %c0_i32_0 : i32, i32, i32
  }
  func.func @transform_5(%arg0: i32, %arg1: i32) -> (i32, i32, i32) {
    %c0_i32 = arith.constant 0 : i32
    %c0_i32_0 = arith.constant 0 : i32
    %c0_i32_1 = arith.constant 0 : i32
    return %arg1, %c0_i32, %c0_i32_0 : i32, i32, i32
  }
  func.func @transform_6(%arg0: i32, %arg1: i32) -> (i32, i32, i32) {
    %c0_i32 = arith.constant 0 : i32
    %c0_i32_0 = arith.constant 0 : i32
    %c0_i32_1 = arith.constant 0 : i32
    return %arg1, %c0_i32, %c0_i32_0 : i32, i32, i32
  }
  func.func @transform_7(%arg0: i32, %arg1: i32) -> (i32, i32, i32) {
    %c0_i32 = arith.constant 0 : i32
    %c0_i32_0 = arith.constant 0 : i32
    %c0_i32_1 = arith.constant 0 : i32
    return %arg1, %c0_i32, %c0_i32_0 : i32, i32, i32
  }
  func.func @transform_8(%arg0: i32, %arg1: i32) -> (i32, i32, i32) {
    %c0_i32 = arith.constant 0 : i32
    %c0_i32_0 = arith.constant 0 : i32
    %c0_i32_1 = arith.constant 0 : i32
    return %arg1, %c0_i32, %c0_i32_0 : i32, i32, i32
  }
  func.func @transform_9(%arg0: i32, %arg1: i32) -> (i32, i32, i32) {
    %c0_i32 = arith.constant 0 : i32
    %c0_i32_0 = arith.constant 0 : i32
    %c0_i32_1 = arith.constant 0 : i32
    return %arg1, %c0_i32, %c0_i32_0 : i32, i32, i32
  }
  func.func @transform_10(%arg0: i32, %arg1: i32) -> (i32, i32, i32) {
    %c0_i32 = arith.constant 0 : i32
    %c0_i32_0 = arith.constant 0 : i32
    %c0_i32_1 = arith.constant 0 : i32
    return %arg1, %c0_i32, %c0_i32_0 : i32, i32, i32
  }
  func.func @transform_11(%arg0: i32, %arg1: i32) -> (i32, i32, i32) {
    %c0_i32 = arith.constant 0 : i32
    %c0_i32_0 = arith.constant 0 : i32
    %c0_i32_1 = arith.constant 0 : i32
    return %arg1, %c0_i32, %c0_i32_0 : i32, i32, i32
  }
  func.func @transform_12(%arg0: i32, %arg1: i32) -> (i32, i32, i32) {
    %c0_i32 = arith.constant 0 : i32
    %c0_i32_0 = arith.constant 0 : i32
    %c0_i32_1 = arith.constant 0 : i32
    return %arg1, %c0_i32, %c0_i32_0 : i32, i32, i32
  }
  func.func @transform_13(%arg0: i32, %arg1: i32) -> (i32, i32, i32) {
    %c0_i32 = arith.constant 0 : i32
    %c0_i32_0 = arith.constant 0 : i32
    %c0_i32_1 = arith.constant 0 : i32
    return %arg1, %c0_i32, %c0_i32_0 : i32, i32, i32
  }
  func.func @transform_14(%arg0: i32, %arg1: i32) -> (i32, i32, i32) {
    %c0_i32 = arith.constant 0 : i32
    %c0_i32_0 = arith.constant 0 : i32
    %c0_i32_1 = arith.constant 0 : i32
    return %arg1, %c0_i32, %c0_i32_0 : i32, i32, i32
  }
  func.func @transform_15(%arg0: i32, %arg1: i32) -> (i32, i32) {
    %c0_i32 = arith.constant 0 : i32
    %c0_i32_0 = arith.constant 0 : i32
    %c0_i32_1 = arith.constant 0 : i32
    return %c0_i32, %c0_i32_0 : i32, i32
  }
  func.func @transform_16(%arg0: i32, %arg1: i32) -> (i32, i32) {
    %c0_i32 = arith.constant 0 : i32
    %c0_i32_0 = arith.constant 0 : i32
    %c0_i32_1 = arith.constant 0 : i32
    return %c0_i32, %c0_i32_0 : i32, i32
  }
  func.func @transform_17(%arg0: i32, %arg1: i32) -> (i32, i32) {
    %c0_i32 = arith.constant 0 : i32
    %c0_i32_0 = arith.constant 0 : i32
    %c0_i32_1 = arith.constant 0 : i32
    return %c0_i32, %c0_i32_0 : i32, i32
  }
  func.func @transform_18(%arg0: i32, %arg1: i32) -> (i32, i32) {
    %c0_i32 = arith.constant 0 : i32
    %c0_i32_0 = arith.constant 0 : i32
    %c0_i32_1 = arith.constant 0 : i32
    return %c0_i32, %c0_i32_0 : i32, i32
  }
  func.func @transform_19(%arg0: i32, %arg1: i32) -> (i32, i32) {
    %c0_i32 = arith.constant 0 : i32
    %c0_i32_0 = arith.constant 0 : i32
    return %arg0, %c0_i32 : i32, i32
  }
}

</mosaic_0001>

<bundles_post_ra>
// kernel: tpu_custom_call.1
= control target key start
LH: loop header
LB: loop body
LE: loop exit
PB: predicated region body
PF: predicated region fallthrough
CT: control target
= control target key end

     0   :  { %s5085_s0 = inlined_call_operand.hbm [shape: bf16[2,16,48], index: 0, kind: input, shape index: {}]   ;;  %s5086_s1 = inlined_call_operand.vmem [shape: bf16[48,128], index: 1, kind: input, shape index: {}]   ;;  %s5087_s2 = inlined_call_operand.vmem [shape: f32[1,128], index: 2, kind: input, shape index: {}]   ;;  %s5088_s3 = inlined_call_operand.hbm [shape: bf16[2,16,128], index: 3, kind: input, shape index: {}]   ;;  %s5089_s4 = inlined_call_operand.hbm [shape: bf16[2,16,128], index: 4, kind: input, shape index: {}]   ;;  %s5090_s5 = inlined_call_operand.hbm [shape: bf16[2,16,128], index: 5, kind: input, shape index: {}]   ;;  %s5091_s6 = inlined_call_operand.hbm [shape: f32[2,1,128], index: 6, kind: input, shape index: {}]   ;;  %s5092_s7 = inlined_call_operand.vmem [shape: bf16[2,128,16], index: 7, kind: input, shape index: {}]   ;;  %s5093_s8 = inlined_call_operand.hbm [shape: f32[2,1,16], index: 8, kind: input, shape index: {}]   ;;  %s5094_s9 = inlined_call_operand.hbm [shape: bf16[2,16,128], index: 9, kind: input, shape index: {}]   ;;  %s5095_s10 = inlined_call_operand.hbm [shape: bf16[2,16,128], index: 10, kind: input, shape index: {}]   ;;  %s5096_s11 = inlined_call_operand.vmem [shape: bf16[2,128,128], index: 11, kind: input, shape index: {}]   ;;  %s5097_s12 = inlined_call_operand.hbm [shape: f32[2,1,128], index: 12, kind: input, shape index: {}]   ;;  %s5098_s13 = inlined_call_operand.hbm [shape: bf16[2,128,128], index: 13, kind: input, shape index: {}]   ;;  %s5099_s14 = inlined_call_operand.hbm [shape: f32[2,1,128], index: 14, kind: input, shape index: {}]   ;;  %s5100_s15 = inlined_call_operand.vmem [shape: f32[16,128], index: 15, kind: input, shape index: {}]   ;;  %s5101_s16 = inlined_call_operand.hbm [shape: f32[16,128], index: 16, kind: input, shape index: {}]   ;;  %s5102_s17 = inlined_call_operand.hbm [shape: bf16[128,128], index: 17, kind: input, shape index: {}]   ;;  %s5103_s18 = inlined_call_operand.vmem [shape: f32[1,128], index: 18, kind: input, shape index: {}]   ;;  %s5104_s19 = inlined_call_operand.hbm [shape: f32[2,128], index: 19, kind: output, shape index: {}]  }
   0x1   :  { %5128 = sst [smem:[#allocation42_spill]] %s5085_s0 }
   0x2   :  { %5129 = sst [smem:[#allocation43_spill]] %s5086_s1 }
   0x3   :  { %5130 = sst [smem:[#allocation44_spill]] %s5087_s2 }
   0x4   :  { %5131 = sst [smem:[#allocation45_spill]] %s5088_s3 }
   0x5   :  { %5132 = sst [smem:[#allocation46_spill]] %s5090_s5 }
   0x6   :  { %5133 = sst [smem:[#allocation47_spill]] %s5092_s7 }
   0x7   :  { %5134 = sst [smem:[#allocation48_spill]] %s5093_s8 }
   0x8   :  { %5135 = sst [smem:[#allocation49_spill]] %s5094_s9 }
   0x9   :  { %5136 = sst [smem:[#allocation50_spill]] %s5096_s11 }
   0xa   :  { %5137 = sst [smem:[#allocation51_spill]] %s5097_s12 }
   0xb   :  { %5138 = sst [smem:[#allocation52_spill]] %s5099_s14 }
   0xc   :  { %5139 = sst [smem:[#allocation53_spill]] %s5100_s15 }
   0xd   :  { %5140 = sst [smem:[#allocation54_spill]] %s5101_s16 }
   0xe   :  { %5141 = sst [smem:[#allocation55_spill]] %s5103_s18 }
   0xf   :  { %5142 = sst [smem:[#allocation56_spill]] %s5104_s19 }
  0x10   :  { %24 = vsyncpa [#allocation4], 0 }
  0x11   :  { %25 = vsyncpa [#allocation7], 0 }
  0x12   :  { %27 = vsyncpa [#allocation7 + $0x1], 0 }
  0x13   :  { %28 = vsyncpa [#allocation10], 0 }
  0x14   :  { %30 = vsyncpa [#allocation10 + $0x1], 0 }
  0x15   :  { %31 = vsyncpa [#allocation13], 0 }
  0x16   :  { %33 = vsyncpa [#allocation13 + $0x1], 0 }
  0x17   :  { %34 = vsyncpa [#allocation16], 0 }
  0x18   :  { %36 = vsyncpa [#allocation16 + $0x1], 0 }
  0x19   :  { %37 = vsyncpa [#allocation19], 0 }
  0x1a   :  { %39 = vsyncpa [#allocation19 + $0x1], 0 }
  0x1b   :  { %40 = vsyncpa [#allocation22], 0 }
  0x1c   :  { %41 = vsyncpa [#allocation5], 0  ;;  %s4273_s0 = smov 0   ;;  %s4275_s30 = smov 0  }
  0x1d   :  { %s4277_s20 = smov 0   ;;  %s4279_s21 = smov 0  }
  0x1e   :  { %s4281_s1 = smov 0   ;;  %s4283_s22 = smov 0  }
  0x1f LB: > { %5143 = sst [smem:[#allocation33_spill]] %s4135_s30  ;;  %s4302_s2 = sadd.s32 4294967295, %s4151_s22   ;;  %s4151_s22 = sphi %s4283_s22, %s47_s22   ;;  %s4147_s1 = sphi %s4281_s1, %s5203_s1   ;;  %s4143_s21 = sphi %s4279_s21, %s5202_s21   ;;  %s4139_s20 = sphi %s4277_s20, %s5200_s20   ;;  %s4135_s30 = sphi %s4275_s30, %s5199_s30   ;;  %s4131_s0 = sphi %s4273_s0, %s5198_s0  }
  0x20   : > { %5144 = sst [smem:[#allocation34_spill]] %s4139_s20  ;;  %p141_p0 = scmp.ne.s32.totalorder %s4139_s20, %s4135_s30 }
  0x21   : > { %5145 = sst [smem:[#allocation35_spill]] %s4143_s21  ;;  %p142_p1 = scmp.eq.s32.totalorder %s4151_s22, 0 }
  0x22   : > { %5146 = sst [smem:[#allocation36_spill]] %s4151_s22  ;;  %p147_p2 = scmp.ne.s32.totalorder %s4135_s30, %s4131_s0 }
  0x23   : > { %5147 = sst [smem:[#allocation37_spill]] %s4302_s2  ;;  %p5106_p3 = scmp.eq.s32.totalorder %s4302_s2, 0 }
  0x24   : > { %p143_p4 = por %p142_p1, %p141_p0  ;;  %p3060_p5 = scmp.ge.s32.totalorder %s4151_s22, 1 }
  0x25   : > { %p4313_p6 = por %p5106_p3, %p147_p2  ;;  %p554_p7 = scmp.lt.s32.totalorder %s4151_s22, 3 }
  0x26   : > { %s4153_s3 = smov [#allocation21]   ;;  %p3500_p10 = scmp.lt.s32.totalorder %s4151_s22, 2 }
  0x27   : > { %s5148_s24 = scalar_select %p4313_p6, 1, 0 }
  0x28   : > { %p4318_p8 = pnand %p3060_p5, %p554_p7  ;;  %s592_s26 = sshll.u32 %s4153_s3, 4  ;;  %s593_s26 = int_to_ptr.vmem [resolvable:$true] %s592_s26 }
  0x29   : > { %5149 = sst [smem:[#allocation38_spill]] %s5148_s24  ;;  %s4332_s28 = sand.u32 1, %s4139_s20  }
  0x2a   : > { %s5150_s25 = scalar_select %p4318_p8, 1, 0 }
  0x2b   : > { %p3456_p9 = pneg %p4318_p8  ;;  %p4334_p12 = pnand %p3500_p10, %p143_p4 }
  0x2c   : > { %5151 = sst [smem:[#allocation39_spill]] %s5150_s25  ;;  %s3702_s0 = scalar_lea.vmem %s593_s26, 256 }
  0x2d   : > { %p4327_p11 = pnand %p3456_p9, %p5106_p3  ;;  %p3703_p0 = scmp.ne.s32.totalorder %s593_s26, %s3702_s0 }
  0x2e   : > { %p3710_p5 = scmp.lt.s32.totalorder %s593_s26, %s593_s26  ;;  %p3711_p7 = scmp.lt.s32.totalorder %s3702_s0, %s3702_s0 }
  0x2f   : > { %p3693_p13 = pneg %p4327_p11 }
  0x30   : > { %p3712_p9 = por %p3711_p7, %p3710_p5 }
  0x31   : > { %p3705_p1 = pnand %p3703_p0, %p3693_p13 }
  0x33   : > { %p3706_p2 = pneg %p3705_p1 }
  0x35   : > { %p3713_p3 = pnand %p3712_p9, %p3706_p2 }
  0x37   : > { %3716 = shalt.err (!%p3713_p3)
}
  0x38   : > { %s4154_s3 = smov 128   ;;  %s4155_s23 = smov 8  }
  0x39   : > { %s5154_s16 = sld [smem:[#allocation54_spill]]  ;;  %s56_s0 = sadd.s32 1, %s4147_s1 }
  0x3a   : > { %p57_p4 = scmp.ge.s32.totalorder %s56_s0, 2  ;;  %s4350_s15 = sand.u32 1, %s4151_s22  }
  0x3b   : > { %s4355_s11 = sshll.u32 %s4332_s28, 3  ;;  %s4360_s21 = sshll.u32 %s4147_s1, 7 }
  0x3c   : > { %s5205_s0 = smov (%p57_p4, %s56_s0), 0  ;;  %s5156_s19 = sld [smem:[#allocation45_spill]] }
  0x3d   : > { %5155 = sst [smem:[#allocation40_spill]] %s5205_s0  ;;  %s131_s7 = ssub.s32 %s4147_s1, %s5205_s0 }
  0x3e   : > { %p132_p3 = scmp.eq.s32.totalorder %s131_s7, 0  ;;  %s5122_s30 = scalar_lea.sflag [#allocation7], %s4350_s15 }
  0x3f   : > { %3462 = dma.hbm_to_vmem [thread:$0]  (!%p4327_p11), %s5154_s16, 256, %s593_s26, [#allocation22], %s4154_s3, %s4154_s3, %s4155_s23  }
  0x40   : > { %s626_s26 = scalar_lea.vmem [#allocation6], %s4355_s11  ;;  %s5157_s16 = sadd.s32 1, %s4139_s20 }
  0x41   : > { %s633_s3 = sshll.u32 %s626_s26, 4  ;;  %p4375_p10 = pneg %p4334_p12  ;;  %s634_s3 = int_to_ptr.vmem [resolvable:$true] %s633_s3 }
  0x42   : > { %s632_s23 = scalar_lea.hbm %s5156_s19, %s4360_s21  ;;  %s3730_s7 = scalar_lea.vmem %s634_s3, 128 }
  0x43   : > { %s4370_s22 = scalar_select %p132_p3, %s4139_s20, %s5157_s16  }
  0x44   : > { %p3731_p0 = scmp.ne.s32.totalorder %s634_s3, %s3730_s7  ;;  %s4156_s24 = smov [#allocation6]  }
  0x45   : > { %5158 = sst [smem:[#allocation41_spill]] %s4370_s22  ;;  %s3735_s18 = sshll.u32 %s4156_s24, 4  ;;  %s3736_s18 = int_to_ptr.vmem [resolvable:$false] %s3735_s18 }
  0x46   : > { %p3733_p1 = pnand %p3731_p0, %p4375_p10  ;;  %s3737_s19 = scalar_lea.vmem %s3736_s18, 256 }
  0x47   : > { %p3738_p5 = scmp.lt.s32.totalorder %s634_s3, %s3736_s18  ;;  %p3739_p7 = scmp.lt.s32.totalorder %s3737_s19, %s3730_s7 }
  0x48   : > { %p3734_p2 = pneg %p3733_p1 }
  0x49   : > { %p3740_p9 = por %p3739_p7, %p3738_p5 }
  0x4b   : > { %p3741_p4 = pnand %p3740_p9, %p3734_p2 }
  0x4d   : > { %3744 = shalt.err (!%p3741_p4)
}
  0x4e   : > { %s4157_s16 = smov 64   ;;  %s4158_s26 = smov 4  }
  0x4f   : > { %3469 = dma.hbm_to_vmem [thread:$0]  (!%p4334_p12), %s632_s23, 128, %s634_s3, %s5122_s30, %s4157_s16, %s4157_s16, %s4158_s26  }
  0x50   : > { %s5160_s5 = sld [smem:[#allocation46_spill]]  ;;  %s668_s19 = scalar_lea.vmem [#allocation9], %s4355_s11 }
  0x51   : > { %s675_s0 = sshll.u32 %s668_s19, 4  ;;  %s4394_s22 = sshll.u32 %s4147_s1, 4  ;;  %s676_s0 = int_to_ptr.vmem [resolvable:$true] %s675_s0 }
  0x52   : > { %s5123_s20 = scalar_lea.sflag [#allocation10], %s4350_s15  ;;  %s3758_s25 = scalar_lea.vmem %s676_s0, 128 }
  0x53   : > { %p3759_p3 = scmp.ne.s32.totalorder %s676_s0, %s3758_s25  ;;  %s4159_s14 = smov [#allocation9]  }
  0x54   : > { %s3763_s12 = sshll.u32 %s4159_s14, 4  ;;  %s3764_s12 = int_to_ptr.vmem [resolvable:$false] %s3763_s12 }
  0x55   : > { %p3761_p0 = pnand %p3759_p3, %p4375_p10  ;;  %s3765_s9 = scalar_lea.vmem %s3764_s12, 256 }
  0x56   : > { %s674_s18 = scalar_lea.hbm %s5160_s5, %s4360_s21  ;;  %p3766_p2 = scmp.lt.s32.totalorder %s676_s0, %s3764_s12 }
  0x57   : > { %p3762_p1 = pneg %p3761_p0  ;;  %p3767_p5 = scmp.lt.s32.totalorder %s3765_s9, %s3758_s25 }
  0x59   : > { %p3768_p7 = por %p3767_p5, %p3766_p2 }
  0x5b   : > { %p3769_p9 = pnand %p3768_p7, %p3762_p1 }
  0x5d   : > { %3772 = shalt.err (!%p3769_p9)
}
  0x5e   : > { %3475 = dma.hbm_to_vmem [thread:$0]  (!%p4334_p12), %s674_s18, 128, %s676_s0, %s5123_s20, %s4157_s16, %s4157_s16, %s4158_s26  }
  0x5f   : > { %s5161_s8 = sld [smem:[#allocation48_spill]]  ;;  %s713_s9 = scalar_lea.vmem [#allocation12], %s4332_s28 }
  0x60   : > { %s720_s25 = sshll.u32 %s713_s9, 4  ;;  %s5124_s3 = scalar_lea.sflag [#allocation13], %s4350_s15  ;;  %s721_s25 = int_to_ptr.vmem [resolvable:$true] %s720_s25 }
  0x61   : > { %s3786_s24 = scalar_lea.vmem %s721_s25, 16  ;;  %s4160_s7 = smov [#allocation12]  }
  0x62   : > { %p3787_p4 = scmp.ne.s32.totalorder %s721_s25, %s3786_s24  ;;  %s3791_s19 = sshll.u32 %s4160_s7, 4  ;;  %s3792_s19 = int_to_ptr.vmem [resolvable:$false] %s3791_s19 }
  0x63   : > { %s3793_s30 = scalar_lea.vmem %s3792_s19, 32  ;;  %p3794_p1 = scmp.lt.s32.totalorder %s721_s25, %s3792_s19 }
  0x64   : > { %p3789_p3 = pnand %p3787_p4, %p4375_p10  ;;  %p3795_p2 = scmp.lt.s32.totalorder %s3793_s30, %s3786_s24 }
  0x65   : > { %s718_s12 = scalar_lea.hbm %s5161_s8, %s4394_s22 }
  0x66   : > { %p3790_p0 = pneg %p3789_p3  ;;  %p3796_p5 = por %p3795_p2, %p3794_p1 }
  0x68   : > { %p3797_p7 = pnand %p3796_p5, %p3790_p0 }
  0x6a   : > { %3800 = shalt.err (!%p3797_p7)
}
  0x6b   : > { %3481 = dma.hbm_to_vmem [thread:$0]  (!%p4334_p12), %s718_s12, 16, %s721_s25, %s5124_s3  }
  0x6c   : > { %s758_s14 = scalar_lea.hbm %s5095_s10, %s4360_s21  ;;  %s752_s23 = scalar_lea.vmem [#allocation15], %s4355_s11 }
  0x6d   : > { %s759_s9 = sshll.u32 %s752_s23, 4  ;;  %s5127_s30 = scalar_lea.sflag [#allocation16], %s4350_s15  ;;  %s760_s9 = int_to_ptr.vmem [resolvable:$true] %s759_s9 }
  0x6e   : > { %s3814_s24 = scalar_lea.vmem %s760_s9, 128  ;;  %s4161_s7 = smov [#allocation15]  }
  0x6f   : > { %p3815_p9 = scmp.ne.s32.totalorder %s760_s9, %s3814_s24  ;;  %s3819_s19 = sshll.u32 %s4161_s7, 4  ;;  %s3820_s19 = int_to_ptr.vmem [resolvable:$false] %s3819_s19 }
  0x70   : > { %s3821_s20 = scalar_lea.vmem %s3820_s19, 256  ;;  %p3822_p0 = scmp.lt.s32.totalorder %s760_s9, %s3820_s19 }
  0x71   : > { %p3817_p4 = pnand %p3815_p9, %p4375_p10  ;;  %p3823_p1 = scmp.lt.s32.totalorder %s3821_s20, %s3814_s24 }
  0x73   : > { %p3818_p3 = pneg %p3817_p4  ;;  %p3824_p2 = por %p3823_p1, %p3822_p0 }
  0x75   : > { %p3825_p5 = pnand %p3824_p2, %p3818_p3 }
  0x77   : > { %3828 = shalt.err (!%p3825_p5)
}
  0x78   : > { %3487 = dma.hbm_to_vmem [thread:$0]  (!%p4334_p12), %s758_s14, 128, %s760_s9, %s5127_s30, %s4157_s16, %s4157_s16, %s4158_s26  }
  0x79   : > { %s3083_s12 = sshll.u32 %s4332_s28, 6  ;;  %s3174_s25 = sshll.u32 %s4147_s1, 10 }
  0x7a   : > { %s804_s20 = scalar_lea.hbm %s5098_s13, %s3174_s25  ;;  %s798_s23 = scalar_lea.vmem [#allocation18], %s3083_s12 }
  0x7b   : > { %s805_s24 = sshll.u32 %s798_s23, 4  ;;  %s5126_s7 = scalar_lea.sflag [#allocation19], %s4350_s15  ;;  %s806_s24 = int_to_ptr.vmem [resolvable:$true] %s805_s24 }
  0x7c   : > { %s3842_s19 = scalar_lea.vmem %s806_s24, 1024  ;;  %s4162_s3 = smov [#allocation18]  }
  0x7d   : > { %p3843_p7 = scmp.ne.s32.totalorder %s806_s24, %s3842_s19  ;;  %s3847_s5 = sshll.u32 %s4162_s3, 4  ;;  %s3848_s5 = int_to_ptr.vmem [resolvable:$false] %s3847_s5 }
  0x7e   : > { %s3849_s8 = scalar_lea.vmem %s3848_s5, 2048  ;;  %p3850_p3 = scmp.lt.s32.totalorder %s806_s24, %s3848_s5 }
  0x7f   : > { %p3845_p9 = pnand %p3843_p7, %p4375_p10  ;;  %p3851_p0 = scmp.lt.s32.totalorder %s3849_s8, %s3842_s19 }
  0x81   : > { %p3846_p4 = pneg %p3845_p9  ;;  %p3852_p1 = por %p3851_p0, %p3850_p3 }
  0x83   : > { %p3853_p2 = pnand %p3852_p1, %p3846_p4 }
  0x85   : > { %3856 = shalt.err (!%p3853_p2)
}
  0x86   : > { %3493 = dma.hbm_to_vmem [thread:$0]  (!%p4334_p12), %s804_s20, 1024, %s806_s24, %s5126_s7, %s4157_s16, %s4157_s16, %s4158_s26  }
  0x87   : > { %s4163_s14 = smov [#allocation3]   ;;  %s4164_s12 = smov [#allocation23]  }
  0x88   : > { %s570_s9 = sshll.u32 %s4163_s14, 4  ;;  %s605_s3 = sshll.u32 %s4164_s12, 4  ;;  %s571_s9 = int_to_ptr.vmem [resolvable:$true] %s570_s9  ;;  %s606_s3 = int_to_ptr.vmem [resolvable:$true] %s605_s3 }
  0x89   : > { %s3868_s5 = scalar_lea.vmem %s571_s9, 256  ;;  %p3876_p4 = scmp.lt.s32.totalorder %s571_s9, %s571_s9 }
  0x8a   : > { %p3869_p5 = scmp.ne.s32.totalorder %s571_s9, %s3868_s5  ;;  %p3877_p3 = scmp.lt.s32.totalorder %s3868_s5, %s3868_s5 }
  0x8c   : > { %p3871_p7 = pnand %p3869_p5, %p3693_p13  ;;  %p3878_p0 = por %p3877_p3, %p3876_p4 }
  0x8e   : > { %p3872_p9 = pneg %p3871_p7 }
  0x90   : > { %p3879_p1 = pnand %p3878_p0, %p3872_p9 }
  0x92   : > { %3882 = shalt.err (!%p3879_p1)
}
  0x93   : > { %s5162_s0 = sld [smem:[#allocation42_spill]]  ;;  %s3894_s18 = scalar_lea.vmem %s606_s3, 1024 }
  0x94   : > { %p3895_p2 = scmp.ne.s32.totalorder %s606_s3, %s3894_s18  ;;  %p3902_p6 = scmp.lt.s32.totalorder %s606_s3, %s606_s3 }
  0x95   : > { %p3903_p4 = scmp.lt.s32.totalorder %s3894_s18, %s3894_s18 }
  0x96   : > { %p3897_p5 = pnand %p3895_p2, %p3693_p13 }
  0x97   : > { %p3904_p9 = por %p3903_p4, %p3902_p6 }
  0x98   : > { %p3898_p7 = pneg %p3897_p5 }
  0x99   : > { %3459 = dma.hbm_to_vmem [thread:$0]  (!%p4327_p11), %s5162_s0, 256, %s571_s9, [#allocation4], %s4157_s16, %s4157_s16, %s4158_s26  }
  0x9a   : > { %p3905_p3 = pnand %p3904_p9, %p3898_p7 }
  0x9c   : > { %3908 = shalt.err (!%p3905_p3)
}
  0x9d   : > { %3465 = dma.hbm_to_vmem [thread:$0]  (!%p4327_p11), %s5102_s17, 1024, %s606_s3, [#allocation22], %s4157_s16, %s4157_s16, %s4158_s26  }
  0x9e   : > { %s653_s14 = scalar_lea.hbm %s5089_s4, %s4360_s21  ;;  %s647_s9 = scalar_lea.vmem [#allocation8], %s4355_s11 }
  0x9f   : > { %s654_s12 = sshll.u32 %s647_s9, 4  ;;  %s693_s8 = scalar_lea.hbm %s5091_s6, %s4394_s22  ;;  %s655_s12 = int_to_ptr.vmem [resolvable:$true] %s654_s12 }
  0xa0   : > { %s3922_s25 = scalar_lea.vmem %s655_s12, 128  ;;  %s4165_s0 = smov [#allocation8]  }
  0xa1   : > { %p3923_p6 = scmp.ne.s32.totalorder %s655_s12, %s3922_s25  ;;  %s3927_s18 = sshll.u32 %s4165_s0, 4  ;;  %s3928_s18 = int_to_ptr.vmem [resolvable:$false] %s3927_s18 }
  0xa2   : > { %s3929_s3 = scalar_lea.vmem %s3928_s18, 256  ;;  %p3930_p11 = scmp.lt.s32.totalorder %s655_s12, %s3928_s18 }
  0xa3   : > { %p3925_p13 = pnand %p3923_p6, %p4375_p10  ;;  %p3931_p1 = scmp.lt.s32.totalorder %s3929_s3, %s3922_s25 }
  0xa5   : > { %p3926_p0 = pneg %p3925_p13  ;;  %p3932_p2 = por %p3931_p1, %p3930_p11 }
  0xa7   : > { %p3933_p5 = pnand %p3932_p2, %p3926_p0 }
  0xa9   : > { %3936 = shalt.err (!%p3933_p5)
}
  0xaa   : > { %s5163_s20 = scalar_lea.sflag [#allocation7], %s4350_s15  ;;  %s688_s23 = scalar_lea.vmem [#allocation11], %s4332_s28 }
  0xab   : > { %3472 = dma.hbm_to_vmem [thread:$0]  (!%p4334_p12), %s653_s14, 128, %s655_s12, %s5163_s20, %s4157_s16, %s4157_s16, %s4158_s26  }
  0xac   : > { %s695_s24 = sshll.u32 %s688_s23, 4  ;;  %s5164_s5 = sld [smem:[#allocation49_spill]]  ;;  %s696_s24 = int_to_ptr.vmem [resolvable:$true] %s695_s24 }
  0xad   : > { %s3950_s25 = scalar_lea.vmem %s696_s24, 16  ;;  %s4166_s0 = smov [#allocation11]  }
  0xae   : > { %p3951_p7 = scmp.ne.s32.totalorder %s696_s24, %s3950_s25  ;;  %s3955_s18 = sshll.u32 %s4166_s0, 4  ;;  %s3956_s18 = int_to_ptr.vmem [resolvable:$false] %s3955_s18 }
  0xaf   : > { %s3957_s3 = scalar_lea.vmem %s3956_s18, 32  ;;  %p3958_p3 = scmp.lt.s32.totalorder %s696_s24, %s3956_s18 }
  0xb0   : > { %p3953_p4 = pnand %p3951_p7, %p4375_p10  ;;  %p3959_p6 = scmp.lt.s32.totalorder %s3957_s3, %s3950_s25 }
  0xb2   : > { %s737_s27 = scalar_lea.hbm %s5164_s5, %s4360_s21  ;;  %p3954_p9 = pneg %p3953_p4 }
  0xb3   : > { %p3960_p13 = por %p3959_p6, %p3958_p3 }
  0xb5   : > { %p3961_p0 = pnand %p3960_p13, %p3954_p9 }
  0xb7   : > { %3964 = shalt.err (!%p3961_p0)
}
  0xb8   : > { %s5165_s14 = scalar_lea.sflag [#allocation10], %s4350_s15  ;;  %s731_s23 = scalar_lea.vmem [#allocation14], %s4355_s11 }
  0xb9   : > { %3478 = dma.hbm_to_vmem [thread:$0]  (!%p4334_p12), %s693_s8, 16, %s696_s24, %s5165_s14  }
  0xba   : > { %s738_s19 = sshll.u32 %s731_s23, 4  ;;  %s5166_s0 = sld [smem:[#allocation51_spill]]  ;;  %s739_s19 = int_to_ptr.vmem [resolvable:$true] %s738_s19 }
  0xbb   : > { %s3978_s7 = scalar_lea.vmem %s739_s19, 128  ;;  %s4167_s30 = smov [#allocation14]  }
  0xbc   : > { %p3979_p11 = scmp.ne.s32.totalorder %s739_s19, %s3978_s7  ;;  %s3983_s12 = sshll.u32 %s4167_s30, 4  ;;  %s3984_s12 = int_to_ptr.vmem [resolvable:$false] %s3983_s12 }
  0xbd   : > { %s3985_s20 = scalar_lea.vmem %s3984_s12, 256  ;;  %p3986_p5 = scmp.lt.s32.totalorder %s739_s19, %s3984_s12 }
  0xbe   : > { %p3981_p1 = pnand %p3979_p11, %p4375_p10  ;;  %p3987_p7 = scmp.lt.s32.totalorder %s3985_s20, %s3978_s7 }
  0xc0   : > { %s785_s3 = scalar_lea.hbm %s5166_s0, %s4394_s22  ;;  %p3982_p2 = pneg %p3981_p1 }
  0xc1   : > { %p3988_p4 = por %p3987_p7, %p3986_p5 }
  0xc3   : > { %p3989_p9 = pnand %p3988_p4, %p3982_p2 }
  0xc5   : > { %3992 = shalt.err (!%p3989_p9)
}
  0xc6   : > { %s5168_s11 = scalar_lea.sflag [#allocation13], %s4350_s15  ;;  %s780_s30 = scalar_lea.vmem [#allocation17], %s4332_s28 }
  0xc7   : > { %3484 = dma.hbm_to_vmem [thread:$0]  (!%p4334_p12), %s737_s27, 128, %s739_s19, %s5168_s11, %s4157_s16, %s4157_s16, %s4158_s26  }
  0xc8   : > { %s787_s7 = sshll.u32 %s780_s30, 4  ;;  %s5169_s9 = sld [smem:[#allocation52_spill]]  ;;  %s788_s7 = int_to_ptr.vmem [resolvable:$true] %s787_s7 }
  0xc9   : > { %s4006_s0 = scalar_lea.vmem %s788_s7, 16  ;;  %s4168_s12 = smov [#allocation17]  }
  0xca   : > { %p4007_p3 = scmp.ne.s32.totalorder %s788_s7, %s4006_s0  ;;  %s4011_s20 = sshll.u32 %s4168_s12, 4  ;;  %s4012_s20 = int_to_ptr.vmem [resolvable:$false] %s4011_s20 }
  0xcb   : > { %s4013_s21 = scalar_lea.vmem %s4012_s20, 32  ;;  %p4014_p0 = scmp.lt.s32.totalorder %s788_s7, %s4012_s20 }
  0xcc   : > { %p4009_p6 = pnand %p4007_p3, %p4375_p10  ;;  %p4015_p11 = scmp.lt.s32.totalorder %s4013_s21, %s4006_s0 }
  0xce   : > { %s823_s25 = scalar_lea.hbm %s5169_s9, %s4394_s22  ;;  %p4010_p13 = pneg %p4009_p6 }
  0xcf   : > { %p4016_p1 = por %p4015_p11, %p4014_p0 }
  0xd1   : > { %p4017_p2 = pnand %p4016_p1, %p4010_p13 }
  0xd3   : > { %4020 = shalt.err (!%p4017_p2)
}
  0xd4   : > { %s5170_s16 = scalar_lea.sflag [#allocation16], %s4350_s15  ;;  %s818_s19 = scalar_lea.vmem [#allocation20], %s4332_s28 }
  0xd5   : > { %3490 = dma.hbm_to_vmem [thread:$0]  (!%p4334_p12), %s785_s3, 16, %s788_s7, %s5170_s16  }
  0xd6   : > { %s825_s11 = sshll.u32 %s818_s19, 4  ;;  %s4169_s24 = smov [#allocation20]   ;;  %s826_s11 = int_to_ptr.vmem [resolvable:$true] %s825_s11 }
  0xd7   : > { %s4034_s8 = scalar_lea.vmem %s826_s11, 16  ;;  %s4039_s30 = sshll.u32 %s4169_s24, 4  ;;  %s4040_s30 = int_to_ptr.vmem [resolvable:$false] %s4039_s30 }
  0xd8   : > { %p4035_p5 = scmp.ne.s32.totalorder %s826_s11, %s4034_s8  ;;  %s4041_s14 = scalar_lea.vmem %s4040_s30, 32 }
  0xd9   : > { %p4042_p9 = scmp.lt.s32.totalorder %s826_s11, %s4040_s30  ;;  %p4043_p3 = scmp.lt.s32.totalorder %s4041_s14, %s4034_s8 }
  0xda   : > { %p4037_p7 = pnand %p4035_p5, %p4375_p10 }
  0xdb   : > { %p4044_p6 = por %p4043_p3, %p4042_p9 }
  0xdc   : > { %p4038_p4 = pneg %p4037_p7 }
  0xde   : > { %p4045_p13 = pnand %p4044_p6, %p4038_p4 }
  0xe0   : > { %4048 = shalt.err (!%p4045_p13)
}
  0xe1   : > { %s5171_s28 = scalar_lea.sflag [#allocation19], %s4350_s15  ;;  %834 = sbr.rel (%p4318_p8) target bundleno = 2489 (0x9b9), region = 96 }
  0xe2   : > { %3496 = dma.hbm_to_vmem [thread:$0]  (!%p4334_p12), %s823_s25, 16, %s826_s11, %s5171_s28  }
  0xe3   : > { %s5173_s23 = sld [smem:[#allocation37_spill]] (!%p4318_p8) }
  0xe9   : > { %p5174_p10 = scmp.eq.s32.totalorder %s5173_s23, 0 }
  0xeb   : > { %4098 = dma.done.wait (%p5174_p10), [#allocation4], 256   ;;  %p5175_p0 = pmov %p5174_p10 }
  0xec   : > { %s5176_s0 = sld [smem:[#allocation33_spill]]  ;;  %s840_s12 = sand.u32 1, %s5173_s23  }
  0xed   : > { %4100 = vsyncadd (%p5175_p0), [#allocation4], 4294967040  ;;  %s5177_s29 = sld [smem:[#allocation38_spill]]  ;;  %s841_s22 = scalar_lea.sflag [#allocation7], %s840_s12 }
  0xf2   : > { %s4559_s15 = sand.u32 1, %s5176_s0  }
  0xf3   : > { %s4562_s20 = sshll.u32 %s4559_s15, 3  ;;  %p5178_p12 = scmp.ne.s32.totalorder %s5177_s29, 0 }
  0xf4   : > { %s844_s25 = scalar_lea.vmem [#allocation6], %s4562_s20 }
  0xf5   : > { %4102 = dma.done.wait (%p5178_p12), %s841_s22, 256  }
  0xf6   : > { %4104 = vsyncadd (%p5178_p12), %s841_s22, 4294967040  ;;  %s853_s21 = scalar_lea.vmem [#allocation8], %s4562_s20  ;;  %s859_s16 = scalar_lea.sflag [#allocation10], %s840_s12 }
  0xf7   : > { %s862_s26 = scalar_lea.vmem [#allocation9], %s4562_s20 }
  0xf8   : > { %4106 = dma.done.wait (%p5178_p12), %s859_s16, 144  }
  0xf9   : > { %4108 = vsyncadd (%p5178_p12), %s859_s16, 4294967152  ;;  %s876_s19 = scalar_lea.sflag [#allocation13], %s840_s12 }
  0xfa   : > { %4110 = dma.done.wait (%p5178_p12), %s876_s19, 144  }
  0xfb   : > { %4112 = vsyncadd (%p5178_p12), %s876_s19, 4294967152  ;;  %s893_s24 = scalar_lea.sflag [#allocation16], %s840_s12 }
  0xfc   : > { %4114 = dma.done.wait (%p5178_p12), %s893_s24, 144  }
  0xfd   : > { %4116 = vsyncadd (%p5178_p12), %s893_s24, 4294967152  ;;  %s3094_s14 = sshll.u32 %s4559_s15, 6  ;;  %s910_s3 = scalar_lea.sflag [#allocation19], %s840_s12 }
  0xfe   : > { %s4589_s7 = scalar_lea.vmem [#allocation18], %s3094_s14 }
  0xff   : > { %4118 = dma.done.wait (%p5178_p12), %s910_s3, 1040  }
 0x100   : > { %4120 = vsyncadd (%p5178_p12), %s910_s3, 4294966256  ;;  %p5179_p8 = pmov %p5175_p0 }
 0x101   : > { %p5180_p11 = pmov %p5175_p0 }
 0x102   : > { %4122 = dma.done.wait (%p5179_p8), [#allocation22], 1280  }
 0x103   : > { %4124 = vsyncadd (%p5180_p11), [#allocation22], 4294966016  ;;  %s5181_s0 = sld [smem:[#allocation35_spill]] }
 0x104   : > { %s5182_s24 = sld [smem:[#allocation47_spill]] }
 0x105   : > { %s5183_s28 = sld [smem:[#allocation50_spill]] }
 0x109   : > { %p1031_p1 = scmp.lt.s32.totalorder %s5181_s0, 1  ;;  %p3101_p2 = scmp.ne.s32.totalorder %s5181_s0, 0 }
 0x10a   : > { %s5184_s8 = sld [smem:[#allocation43_spill]] (!%p3101_p2) }
 0x10b   : > { %s1032_s22 = scalar_select %p1031_p1, %s5181_s0, 1 }
 0x10c   : > { %1045 = sbr.rel (%p3101_p2) target bundleno = 488 (0x1e8), region = 152  ;;  %s5185_s0 = sld [smem:[#allocation44_spill]] (!%p3101_p2) }
 0x10d   : > { %s3175_s12 = sshll.u32 %s1032_s22, 6 }
 0x10e   : > { %s4605_s14 = scalar_lea.vmem %s5182_s24, %s3175_s12  ;;  %s4610_s30 = scalar_lea.vmem %s5183_s28, %s3175_s12 }
 0x111   : > { %v3565_v0 = vld [vmem:[%s5184_s8 + $0x10] sm:$0xff]   ;;  %v3566_v1 = vld [vmem:[%s5184_s8 + $0x8] sm:$0xff]   ;;  %vm1091_vm0 = vcmask 392192   ;;  %v3568_v2 = vld [vmem:[#allocation3] sm:$0xff]  }
 0x112   : > { %3268 = vmatprep.subr.bf16.mxu0 %v3565_v0  ;;  %v3567_v3 = vld [vmem:[%s5184_s8] sm:$0xff]   ;;  %3274 = vmatprep.mubr.msk.bf16.mxu0 %vm1091_vm0, %v3568_v2  ;;  %v3569_v4 = vld [vmem:[#allocation3 + $0x8] sm:$0xff]  }
 0x113   : > { %3269 = vmatpush3.bf16.msra.mxu0 %v3565_v0  ;;  %v3102_v5 = vld [vmem:[%s5185_s0] ss:$0 sm:$0xff] }
 0x114   : > { %3270 = vmatprep.subr.bf16.mxu0 %v3566_v1 }
 0x117   : > { %3271 = vmatpush3.bf16.msra.mxu0 %v3566_v1 }
 0x118   : > { %3272 = vmatprep.subr.bf16.mxu0 %v3567_v3 }
 0x11b   : > { %3273 = vmatpush3.bf16.msra.mxu0 %v3567_v3 }
 0x11e   : > { %3275 = vmatmul.mubr.msk.bf16.vlgmr.msra.gmra.mxu0 %vm1091_vm0, %v3569_v4 }
 0x1de   : > { %v3276_v6 = vpop.f32.mrf.mxu0 }
 0x1df   : > { %v1141_v7 = vadd.f32 %v3276_v6, %v3102_v5 }
 0x1e0   : > { %v1132_v8 = vpop.f32.mrf.mxu0 }
 0x1e1   : > { %1149 = vst [vmem:[#allocation2 + $0x18] sm:$0xff] %v1141_v7  ;;  %v1133_v9 = vadd.f32 %v3102_v5, %v1132_v8 }
 0x1e2   : > { %v3277_v10 = vpop.f32.mrf.mxu0 }
 0x1e3   : > { %1147 = vst [vmem:[#allocation2 + $0x10] sm:$0xff] %v1133_v9  ;;  %v1144_v11 = vadd.f32 %v3277_v10, %v3102_v5 }
 0x1e4   : > { %v1135_v12 = vpop.f32.mrf.mxu0 }
 0x1e5   : > { %1150 = vst [vmem:[#allocation2 + $0x8] sm:$0xff] %v1144_v11  ;;  %v1136_v13 = vadd.f32 %v3102_v5, %v1135_v12 }
 0x1e7   : > { %1148 = vst [vmem:[#allocation2] sm:$0xff] %v1136_v13 }
 0x1e8 PF: > { %v4634_v18 = vld [vmem:[#allocation2 + $0x18] sm:$0xff]  ;;  %v3182_v5 = vld [vmem:[%s853_s21] sm:$0xff]   ;;  %vm1334_vm1 = vcmask 130048   ;;  %s5187_s21 = scalar_lea.vmem [#allocation12], %s4559_s15  ;;  %s5189_s27 = scalar_lea.vmem [#allocation15], %s4562_s20 }
 0x1e9   : > { %v1187_v20 = vmul.f32 %v4634_v18, %v4634_v18  ;;  %v3178_v4 = vld [vmem:[%s844_s25] sm:$0xff]   ;;  %v3183_v11 = vunpack.c.l.bf16 %v3182_v5  ;;  %s5186_s25 = scalar_lea.vmem [#allocation11], %s4559_s15  ;;  %s5191_s11 = scalar_lea.vmem [#allocation20], %s4559_s15 }
 0x1ea   : > { %v4625_v14 = vld [vmem:[#allocation2 + $0x10] sm:$0xff]  ;;  %v3179_v6 = vunpack.c.l.bf16 %v3178_v4  ;;  %v3180_v10 = vunpack.c.h.bf16 %v3178_v4 }
 0x1eb   : > { %1163 = vadd.xlane.f32.xlu0 %v4625_v14  ;;  %v1185_v16 = vmul.f32 %v4625_v14, %v4625_v14 }
 0x1ec   : > { %v4637_v19 = vld [vmem:[#allocation2 + $0x8] sm:$0xff] }
 0x1ed   : > { %1189 = vadd.xlane.f32.xlu1 %v1185_v16  ;;  %v1188_v21 = vmul.f32 %v4637_v19, %v4637_v19 }
 0x1ee   : > { %v4627_v15 = vld [vmem:[#allocation2] sm:$0xff] }
 0x1ef   : > { %v1186_v17 = vmul.f32 %v4627_v15, %v4627_v15  ;;  %1165 = vadd.xlane.f32.xlu0 %v4627_v15 }
 0x1f1   : > { %1191 = vadd.xlane.f32.xlu1 %v1186_v17  ;;  %v3184_v17 = vunpack.c.h.bf16 %v3182_v5 }
 0x1f3   : > { %1167 = vadd.xlane.f32.xlu0 %v4634_v18 }
 0x1f5   : > { %1169 = vadd.xlane.f32.xlu1 %v4637_v19 }
 0x1f7   : > { %1193 = vadd.xlane.f32.xlu0 %v1187_v20 }
 0x1f9   : > { %1195 = vadd.xlane.f32.xlu1 %v1188_v21 }
 0x274   : > { %v1164_v22 = vpop.xlane.xlu0 %1163 }
 0x276   : > { %v1190_v23 = vpop.xlane.xlu1 %1189 }
 0x278   : > { %v1166_v24 = vpop.xlane.xlu0 %1165 }
 0x279   : > { %v1171_v25 = vadd.f32 %v1166_v24, %v1164_v22 }
 0x27a   : > { %v1192_v26 = vpop.xlane.xlu1 %1191 }
 0x27b   : > { %v1172_v27 = vrot.slane %v1171_v25, 4  ;;  %v1197_v28 = vadd.f32 %v1192_v26, %v1190_v23 }
 0x27c   : > { %v1168_v29 = vpop.xlane.xlu0 %1167 }
 0x27d   : > { %v1173_v30 = vadd.f32 %v1172_v27, %v1171_v25  ;;  %v1198_v31 = vrot.slane %v1197_v28, 4 }
 0x27e   : > { %v1170_v32 = vpop.xlane.xlu1 %1169 }
 0x27f   : > { %v1174_v33 = vrot.slane %v1173_v30, 2  ;;  %v1199_v34 = vadd.f32 %v1198_v31, %v1197_v28  ;;  %v1178_v35 = vadd.f32 %v1170_v32, %v1168_v29  ;;  %v3570_v28 = vld [vmem:[%s862_s26] sm:$0xff]   ;;  %s5188_s26 = scalar_lea.vmem [#allocation14], %s4562_s20  ;;  %s5190_s20 = scalar_lea.vmem [#allocation17], %s4559_s15 }
 0x280   : > { %v1194_v36 = vpop.xlane.xlu0 %1193  ;;  %3278 = vmatprep.subr.bf16.mxu0 %v3570_v28  ;;  %s5192_s15 = sld [smem:[#allocation35_spill]] }
 0x281   : > { %v1175_v37 = vadd.f32 %v1174_v33, %v1173_v30  ;;  %v1200_v38 = vrot.slane %v1199_v34, 2  ;;  %v1179_v39 = vrot.slane %v1178_v35, 4  ;;  %3279 = vmatpush3.bf16.msra.mxu0 %v3570_v28 }
 0x282   : > { %v1196_v40 = vpop.xlane.xlu1 %1195 }
 0x283   : > { %v1176_v41 = vrot.slane %v1175_v37, 1  ;;  %v1201_v42 = vadd.f32 %v1200_v38, %v1199_v34  ;;  %v1180_v43 = vadd.f32 %v1179_v39, %v1178_v35  ;;  %v1204_v44 = vadd.f32 %v1196_v40, %v1194_v36 }
 0x285   : > { %v1177_v45 = vadd.f32 %v1176_v41, %v1175_v37  ;;  %v1202_v46 = vrot.slane %v1201_v42, 1  ;;  %v1181_v47 = vrot.slane %v1180_v43, 2  ;;  %v1205_v48 = vrot.slane %v1204_v44, 4 }
 0x286   : > { %p3155_p5 = scmp.ne.s32.totalorder %s5192_s15, 1 }
 0x287   : > { %v1211_v49 = vmul.f32 0.001953125, %v1177_v45  ;;  %v1203_v50 = vadd.f32 %v1202_v46, %v1201_v42  ;;  %v1182_v51 = vadd.f32 %v1181_v47, %v1180_v43  ;;  %v1206_v52 = vadd.f32 %v1205_v48, %v1204_v44  ;;  %s5193_s12 = sld [smem:[#allocation53_spill]] (!%p3155_p5) }
 0x288   : > { %s5194_s3 = sld [smem:[#allocation55_spill]] (!%p3155_p5) }
 0x289   : > { %v1215_v53 = vmul.f32 %v1211_v49, %v1211_v49  ;;  %v1213_v54 = vmul.f32 0.001953125, %v1203_v50  ;;  %v1183_v55 = vrot.slane %v1182_v51, 1  ;;  %v1207_v56 = vrot.slane %v1206_v52, 2 }
 0x28a   : > { %v1219_v7 = vsub.f32 %v4625_v14, %v1211_v49  ;;  %v1220_v8 = vsub.f32 %v4627_v15, %v1211_v49 }
 0x28b   : > { %v1217_v57 = vsub.f32 %v1213_v54, %v1215_v53  ;;  %v1184_v58 = vadd.f32 %v1183_v55, %v1182_v51  ;;  %v1208_v59 = vadd.f32 %v1207_v56, %v1206_v52 }
 0x28d   : > { %v1223_v60 = vadd.f32 1e-05, %v1217_v57  ;;  %v1212_v61 = vmul.f32 0.001953125, %v1184_v58  ;;  %v1209_v62 = vrot.slane %v1208_v59, 1 }
 0x28f   : > { %3595 = vrsqrt.f32 %v1223_v60  ;;  %v1216_v63 = vmul.f32 %v1212_v61, %v1212_v61  ;;  %v1210_v0 = vadd.f32 %v1209_v62, %v1208_v59  ;;  %v1221_v22 = vsub.f32 %v4634_v18, %v1212_v61 }
 0x290   : > { %v1222_v23 = vsub.f32 %v4637_v19, %v1212_v61 }
 0x291   : > { %v1214_v1 = vmul.f32 0.001953125, %v1210_v0 }
 0x293   : > { %v1218_v2 = vsub.f32 %v1214_v1, %v1216_v63 }
 0x295   : > { %v1224_v3 = vadd.f32 1e-05, %v1218_v2 }
 0x297   : > { %3597 = vrsqrt.f32 %v1224_v3 }
 0x29c   : > { %v3596_v9 = vpop.eup %3595 }
 0x29d   : > { %v1227_v12 = vmul.f32 %v3596_v9, %v1219_v7  ;;  %v1228_v13 = vmul.f32 %v3596_v9, %v1220_v8 }
 0x29f   : > { %v1231_v16 = vmul.f32 %v3179_v6, %v1227_v12  ;;  %v1232_v21 = vmul.f32 %v3180_v10, %v1228_v13  ;;  %v3572_v13 = vld [vmem:[%s4605_s14 + $0x30] sm:$0xff]  }
 0x2a1   : > { %v1235_v20 = vadd.f32 %v3183_v11, %v1231_v16  ;;  %v1236_v25 = vadd.f32 %v3184_v17, %v1232_v21  ;;  %v3575_v21 = vld [vmem:[%s4605_s14 + $0x18] sm:$0xff]  }
 0x2a3   : > { %1239 = vxpose.xlu0.b32.start [1/2] (short) %v1235_v20, 128  ;;  %v3574_v20 = vld [vmem:[%s4605_s14 + $0x20] sm:$0xff]  }
 0x2a4   : > { %v3598_v24 = vpop.eup %3597 }
 0x2a5   : > { %v1229_v14 = vmul.f32 %v3598_v24, %v1221_v22  ;;  %v1230_v26 = vmul.f32 %v3598_v24, %v1222_v23  ;;  %v3576_v22 = vld [vmem:[%s4605_s14 + $0x10] sm:$0xff]   ;;  %v3577_v23 = vld [vmem:[%s4605_s14 + $0x8] sm:$0xff]   ;;  %v3578_v24 = vld [vmem:[%s4605_s14] sm:$0xff]  }
 0x2a7   : > { %1240 = vxpose.xlu0.b32.end [2/2] (short) %v1236_v25, 128  ;;  %v1233_v15 = vmul.f32 %v3179_v6, %v1229_v14  ;;  %v1234_v27 = vmul.f32 %v3180_v10, %v1230_v26  ;;  %v4681_v25 = vld [vmem:[%s5186_s25] ss:$0 sm:$0xff] }
 0x2a9   : > { %v1237_v29 = vadd.f32 %v3183_v11, %v1233_v15  ;;  %v1238_v30 = vadd.f32 %v3184_v17, %v1234_v27  ;;  %v3571_v11 = vld [vmem:[%s4605_s14 + $0x38] sm:$0xff]   ;;  %v3573_v17 = vld [vmem:[%s4605_s14 + $0x28] sm:$0xff]  }
 0x2aa   : > { %3312 = vmatprep.subr.bf16.mxu1 %v3571_v11 }
 0x2ab   : > { %1271 = vxpose.xlu1.b32.start [1/2] (short) %v1237_v29, 128  ;;  %3313 = vmatpush3.bf16.msra.mxu1 %v3571_v11 }
 0x2ac   : > { %3314 = vmatprep.subr.bf16.mxu1 %v3572_v13 }
 0x2af   : > { %1272 = vxpose.xlu1.b32.end [2/2] (short) %v1238_v30, 128  ;;  %3315 = vmatpush3.bf16.msra.mxu1 %v3572_v13 }
 0x2b0   : > { %3316 = vmatprep.subr.bf16.mxu1 %v3573_v17 }
 0x2b3   : > { %3317 = vmatpush3.bf16.msra.mxu1 %v3573_v17 }
 0x2b4   : > { %3318 = vmatprep.subr.bf16.mxu1 %v3574_v20 }
 0x2b7   : > { %3319 = vmatpush3.bf16.msra.mxu1 %v3574_v20 }
 0x2b8   : > { %3320 = vmatprep.subr.bf16.mxu1 %v3575_v21 }
 0x2bb   : > { %3321 = vmatpush3.bf16.msra.mxu1 %v3575_v21 }
 0x2bc   : > { %3322 = vmatprep.subr.bf16.mxu1 %v3576_v22 }
 0x2bf   : > { %3323 = vmatpush3.bf16.msra.mxu1 %v3576_v22 }
 0x2c0   : > { %3324 = vmatprep.subr.bf16.mxu1 %v3577_v23 }
 0x2c3   : > { %3325 = vmatpush3.bf16.msra.mxu1 %v3577_v23 }
 0x2c4   : > { %3326 = vmatprep.subr.bf16.mxu1 %v3578_v24 }
 0x2c7   : > { %3327 = vmatpush3.bf16.msra.mxu1 %v3578_v24 }
 0x31f   : > { %v1255_v31 = vpop.trf.xlu0 }
 0x323   : > { %v1256_v18 = vpop.trf.xlu0 }
 0x324   : > { %v1303_v19 = vpack.c.bf16 %v1256_v18, %v1255_v31 }
 0x326   : > { %3280 = vmatprep.mubr.msk.bf16.mxu0 %vm1334_vm1, %v1303_v19 }
 0x327   : > { %v1257_v32 = vpop.trf.xlu0  ;;  %v1287_v33 = vpop.trf.xlu1 }
 0x32b   : > { %v1258_v34 = vpop.trf.xlu0  ;;  %v1288_v35 = vpop.trf.xlu1 }
 0x32c   : > { %v1304_v36 = vpack.c.bf16 %v1258_v34, %v1257_v32  ;;  %v1311_v0 = vpack.c.bf16 %v1288_v35, %v1287_v33 }
 0x32e   : > { %3281 = vmatmul.mubr.msk.bf16.vlgmr.msra.gmra.mxu0 %vm1334_vm1, %v1304_v36 }
 0x32f   : > { %v1259_v37 = vpop.trf.xlu0  ;;  %v1289_v38 = vpop.trf.xlu1 }
 0x333   : > { %v1260_v39 = vpop.trf.xlu0  ;;  %v1290_v40 = vpop.trf.xlu1 }
 0x334   : > { %v1305_v41 = vpack.c.bf16 %v1260_v39, %v1259_v37  ;;  %v1312_v3 = vpack.c.bf16 %v1290_v40, %v1289_v38 }
 0x336   : > { %3284 = vmatprep.mubr.msk.bf16.mxu0 %vm1334_vm1, %v1305_v41 }
 0x337   : > { %v1261_v42 = vpop.trf.xlu0  ;;  %v1291_v43 = vpop.trf.xlu1 }
 0x33b   : > { %v1262_v44 = vpop.trf.xlu0  ;;  %v1292_v45 = vpop.trf.xlu1 }
 0x33c   : > { %v1306_v46 = vpack.c.bf16 %v1262_v44, %v1261_v42  ;;  %v1313_v2 = vpack.c.bf16 %v1292_v45, %v1291_v43 }
 0x33e   : > { %3285 = vmatmul.mubr.msk.bf16.gmra.mxu0 %vm1334_vm1, %v1306_v46 }
 0x33f   : > { %v1263_v47 = vpop.trf.xlu0  ;;  %v1293_v48 = vpop.trf.xlu1 }
 0x343   : > { %v1264_v49 = vpop.trf.xlu0  ;;  %v1294_v52 = vpop.trf.xlu1 }
 0x344   : > { %v1307_v50 = vpack.c.bf16 %v1264_v49, %v1263_v47  ;;  %v1314_v5 = vpack.c.bf16 %v1294_v52, %v1293_v48 }
 0x346   : > { %3288 = vmatprep.mubr.msk.bf16.mxu0 %vm1334_vm1, %v1307_v50 }
 0x347   : > { %v1265_v51 = vpop.trf.xlu0  ;;  %v1295_v55 = vpop.trf.xlu1 }
 0x34b   : > { %v1266_v53 = vpop.trf.xlu0  ;;  %v1296_v58 = vpop.trf.xlu1 }
 0x34c   : > { %v1308_v54 = vpack.c.bf16 %v1266_v53, %v1265_v51  ;;  %v1315_v6 = vpack.c.bf16 %v1296_v58, %v1295_v55 }
 0x34e   : > { %3289 = vmatmul.mubr.msk.bf16.gmra.mxu0 %vm1334_vm1, %v1308_v54 }
 0x34f   : > { %v1267_v56 = vpop.trf.xlu0  ;;  %v1297_v61 = vpop.trf.xlu1 }
 0x353   : > { %v1268_v57 = vpop.trf.xlu0  ;;  %v1298_v1 = vpop.trf.xlu1 }
 0x354   : > { %v1309_v59 = vpack.c.bf16 %v1268_v57, %v1267_v56  ;;  %v1316_v9 = vpack.c.bf16 %v1298_v1, %v1297_v61 }
 0x356   : > { %3292 = vmatprep.mubr.msk.bf16.mxu0 %vm1334_vm1, %v1309_v59 }
 0x357   : > { %v1269_v60 = vpop.trf.xlu0  ;;  %v1299_v4 = vpop.trf.xlu1 }
 0x35b   : > { %v1270_v62 = vpop.trf.xlu0  ;;  %v1300_v7 = vpop.trf.xlu1 }
 0x35c   : > { %v1310_v63 = vpack.c.bf16 %v1270_v62, %v1269_v60  ;;  %v1317_v10 = vpack.c.bf16 %v1300_v7, %v1299_v4 }
 0x35e   : > { %3293 = vmatmul.mubr.msk.bf16.gmra.mxu0 %vm1334_vm1, %v1310_v63 }
 0x35f   : > { %3296 = vmatprep.mubr.msk.bf16.mxu0 %vm1334_vm1, %v1311_v0  ;;  %v1301_v8 = vpop.trf.xlu1 }
 0x363   : > { %v1302_v12 = vpop.trf.xlu1 }
 0x364   : > { %v1318_v16 = vpack.c.bf16 %v1302_v12, %v1301_v8 }
 0x366   : > { %3297 = vmatmul.mubr.msk.bf16.gmra.mxu0 %vm1334_vm1, %v1312_v3 }
 0x367   : > { %3300 = vmatprep.mubr.msk.bf16.mxu0 %vm1334_vm1, %v1313_v2 }
 0x36e   : > { %3301 = vmatmul.mubr.msk.bf16.gmra.mxu0 %vm1334_vm1, %v1314_v5 }
 0x36f   : > { %3304 = vmatprep.mubr.msk.bf16.mxu0 %vm1334_vm1, %v1315_v6 }
 0x376   : > { %3305 = vmatmul.mubr.msk.bf16.gmra.mxu0 %vm1334_vm1, %v1316_v9 }
 0x377   : > { %3308 = vmatprep.mubr.msk.bf16.mxu0 %vm1334_vm1, %v1317_v10 }
 0x37e   : > { %3309 = vmatmul.mubr.msk.bf16.gmra.mxu0 %vm1334_vm1, %v1318_v16 }
 0x3ee   : > { %v3282_v14 = vpop.f32.mrf.mxu0 }
 0x3ef   : > { %v4684_v26 = vadd.f32 %v3282_v14, %v4681_v25 }
 0x3f0   : > { %v1417_v15 = vpop.f32.mrf.mxu0 }
 0x3f1   : > { %v1578_v27 = vmul.f32 0.044715, %v4684_v26  ;;  %v1418_v28 = vadd.f32 %v4681_v25, %v1417_v15 }
 0x3f2   : > { %v3283_v29 = vpop.f32.mrf.mxu0 }
 0x3f3   : > { %v1610_v30 = vmul.f32 %v1578_v27, %v4684_v26  ;;  %v1576_v31 = vmul.f32 0.044715, %v1418_v28  ;;  %v1429_v18 = vadd.f32 %v3283_v29, %v4681_v25  ;;  %v1544_v16 = vmul.f32 0.5, %v1418_v28 }
 0x3f4   : > { %v1420_v19 = vpop.f32.mrf.mxu0 }
 0x3f5   : > { %v1642_v32 = vmul.f32 %v1610_v30, %v4684_v26  ;;  %v1579_v33 = vmul.f32 0.044715, %v1429_v18  ;;  %v1421_v34 = vadd.f32 %v4681_v25, %v1420_v19  ;;  %v1608_v35 = vmul.f32 %v1576_v31, %v1418_v28 }
 0x3f6   : > { %v1547_v20 = vmul.f32 0.5, %v1429_v18 }
 0x3f7   : > { %v1611_v36 = vmul.f32 %v1579_v33, %v1429_v18  ;;  %v1577_v37 = vmul.f32 0.044715, %v1421_v34  ;;  %v1640_v38 = vmul.f32 %v1608_v35, %v1418_v28  ;;  %v1674_v39 = vadd.f32 %v1642_v32, %v4684_v26 }
 0x3f8   : > { %v1545_v14 = vmul.f32 0.5, %v1421_v34 }
 0x3f9   : > { %v1643_v40 = vmul.f32 %v1611_v36, %v1429_v18  ;;  %v1609_v41 = vmul.f32 %v1577_v37, %v1421_v34  ;;  %v1672_v42 = vadd.f32 %v1640_v38, %v1418_v28  ;;  %v1706_v43 = vmul.f32 0.7978846, %v1674_v39 }
 0x3fa   : > { %v1546_v28 = vmul.f32 0.5, %v4684_v26 }
 0x3fb   : > { %v1641_v44 = vmul.f32 %v1609_v41, %v1421_v34  ;;  %v1704_v45 = vmul.f32 0.7978846, %v1672_v42  ;;  %v1675_v46 = vadd.f32 %v1643_v40, %v1429_v18 }
 0x3fd   : > { %v1673_v47 = vadd.f32 %v1641_v44, %v1421_v34  ;;  %3599 = vtanh.f32 %v1704_v45  ;;  %v1707_v48 = vmul.f32 0.7978846, %v1675_v46 }
 0x3fe   : > { %v3286_v49 = vpop.f32.mrf.mxu0  ;;  %3601 = vtanh.f32 %v1706_v43 }
 0x3ff   : > { %v4694_v50 = vadd.f32 %v3286_v49, %v4681_v25  ;;  %v1705_v51 = vmul.f32 0.7978846, %v1673_v47  ;;  %3603 = vtanh.f32 %v1707_v48 }
 0x400   : > { %v1433_v52 = vpop.f32.mrf.mxu0 }
 0x401   : > { %v1582_v53 = vmul.f32 0.044715, %v4694_v50  ;;  %v4698_v54 = vadd.f32 %v4681_v25, %v1433_v52  ;;  %3605 = vtanh.f32 %v1705_v51 }
 0x402   : > { %v3287_v55 = vpop.f32.mrf.mxu0 }
 0x403   : > { %v1614_v56 = vmul.f32 %v1582_v53, %v4694_v50  ;;  %v1580_v57 = vmul.f32 0.044715, %v4698_v54  ;;  %v4703_v58 = vadd.f32 %v3287_v55, %v4681_v25 }
 0x404   : > { %v1436_v59 = vpop.f32.mrf.mxu0 }
 0x405   : > { %v1646_v60 = vmul.f32 %v1614_v56, %v4694_v50  ;;  %v1612_v61 = vmul.f32 %v1580_v57, %v4698_v54  ;;  %v1583_v62 = vmul.f32 0.044715, %v4703_v58  ;;  %v4709_v63 = vadd.f32 %v4681_v25, %v1436_v59 }
 0x407   : > { %v1644_v0 = vmul.f32 %v1612_v61, %v4698_v54  ;;  %v1615_v1 = vmul.f32 %v1583_v62, %v4703_v58  ;;  %v1581_v2 = vmul.f32 0.044715, %v4709_v63  ;;  %v1678_v3 = vadd.f32 %v1646_v60, %v4694_v50 }
 0x409   : > { %v1647_v4 = vmul.f32 %v1615_v1, %v4703_v58  ;;  %v1613_v5 = vmul.f32 %v1581_v2, %v4709_v63  ;;  %v1676_v6 = vadd.f32 %v1644_v0, %v4698_v54  ;;  %v1710_v12 = vmul.f32 0.7978846, %v1678_v3 }
 0x40a   : > { %v3600_v7 = vpop.eup %3599 }
 0x40b   : > { %v3602_v8 = vpop.eup %3601  ;;  %v1645_v9 = vmul.f32 %v1613_v5, %v4709_v63  ;;  %v1708_v10 = vmul.f32 0.7978846, %v1676_v6  ;;  %v1679_v11 = vadd.f32 %v1647_v4, %v4703_v58  ;;  %v1768_v17 = vadd.f32 1.0, %v3600_v7 }
 0x40c   : > { %v3604_v13 = vpop.eup %3603  ;;  %v1770_v15 = vadd.f32 1.0, %v3602_v8  ;;  %v1551_v5 = vmul.f32 0.5, %v4703_v58 }
 0x40d   : > { %v1771_v21 = vadd.f32 1.0, %v3604_v13  ;;  %v1677_v22 = vadd.f32 %v1645_v9, %v4709_v63  ;;  %3607 = vtanh.f32 %v1708_v10  ;;  %v1711_v27 = vmul.f32 0.7978846, %v1679_v11 }
 0x40e   : > { %v3606_v23 = vpop.eup %3605  ;;  %v3290_v24 = vpop.f32.mrf.mxu0  ;;  %3609 = vtanh.f32 %v1710_v12  ;;  %v1800_v34 = vmul.f32 %v1768_v17, %v1544_v16  ;;  %v1802_v37 = vmul.f32 %v1770_v15, %v1546_v28  ;;  %v1548_v12 = vmul.f32 0.5, %v4698_v54 }
 0x40f   : > { %v4722_v29 = vadd.f32 %v3290_v24, %v4681_v25  ;;  %v1769_v30 = vadd.f32 1.0, %v3606_v23  ;;  %v1709_v31 = vmul.f32 0.7978846, %v1677_v22  ;;  %v1803_v32 = vmul.f32 %v1771_v21, %v1547_v20 }
 0x410   : > { %v1449_v19 = vpop.f32.mrf.mxu0  ;;  %3611 = vtanh.f32 %v1711_v27  ;;  %v1549_v13 = vmul.f32 0.5, %v4709_v63  ;;  %v1550_v17 = vmul.f32 0.5, %v4694_v50 }
 0x411   : > { %v1586_v18 = vmul.f32 0.044715, %v4722_v29  ;;  %v4727_v33 = vadd.f32 %v4681_v25, %v1449_v19  ;;  %v1801_v35 = vmul.f32 %v1769_v30, %v1545_v14  ;;  %3613 = vtanh.f32 %v1709_v31 }
 0x412   : > { %v3291_v36 = vpop.f32.mrf.mxu0  ;;  %v1833_v42 = vpack.c.bf16 %v1803_v32, %v1802_v37 }
 0x413   : > { %v1618_v38 = vmul.f32 %v1586_v18, %v4722_v29  ;;  %v1584_v39 = vmul.f32 0.044715, %v4727_v33  ;;  %v4732_v40 = vadd.f32 %v3291_v36, %v4681_v25  ;;  %v1832_v26 = vpack.c.bf16 %v1801_v35, %v1800_v34 }
 0x414   : > { %v1452_v41 = vpop.f32.mrf.mxu0 }
 0x415   : > { %v1650_v43 = vmul.f32 %v1618_v38, %v4722_v29  ;;  %v1616_v44 = vmul.f32 %v1584_v39, %v4727_v33  ;;  %v1587_v45 = vmul.f32 0.044715, %v4732_v40  ;;  %v4738_v46 = vadd.f32 %v4681_v25, %v1452_v41  ;;  %3328 = vmatprep.mubr.bf16.mxu1 %v1832_v26 }
 0x416   : > { %3329 = vmatmul.mubr.bf16.vlgmr.msra.gmra.mxu1 %v1833_v42  ;;  %v1552_v42 = vmul.f32 0.5, %v4727_v33 }
 0x417   : > { %v1648_v47 = vmul.f32 %v1616_v44, %v4727_v33  ;;  %v1619_v48 = vmul.f32 %v1587_v45, %v4732_v40  ;;  %v1585_v49 = vmul.f32 0.044715, %v4738_v46  ;;  %v1682_v51 = vadd.f32 %v1650_v43, %v4722_v29 }
 0x418   : > { %v1554_v43 = vmul.f32 0.5, %v4722_v29  ;;  %v1553_v29 = vmul.f32 0.5, %v4738_v46 }
 0x419   : > { %v1651_v52 = vmul.f32 %v1619_v48, %v4732_v40  ;;  %v1617_v53 = vmul.f32 %v1585_v49, %v4738_v46  ;;  %v1680_v55 = vadd.f32 %v1648_v47, %v4727_v33  ;;  %v1714_v56 = vmul.f32 0.7978846, %v1682_v51 }
 0x41a   : > { %v3608_v57 = vpop.eup %3607  ;;  %v1555_v48 = vmul.f32 0.5, %v4732_v40 }
 0x41b   : > { %v1649_v59 = vmul.f32 %v1617_v53, %v4738_v46  ;;  %v1712_v60 = vmul.f32 0.7978846, %v1680_v55  ;;  %v1683_v61 = vadd.f32 %v1651_v52, %v4732_v40  ;;  %v3610_v62 = vpop.eup %3609  ;;  %3615 = vtanh.f32 %v1714_v56 }
 0x41c   : > { %v1772_v4 = vadd.f32 1.0, %v3608_v57  ;;  %v1774_v9 = vadd.f32 1.0, %v3610_v62 }
 0x41d   : > { %v3612_v0 = vpop.eup %3611  ;;  %v1681_v1 = vadd.f32 %v1649_v59, %v4738_v46  ;;  %3617 = vtanh.f32 %v1712_v60  ;;  %v1715_v2 = vmul.f32 0.7978846, %v1683_v61 }
 0x41e   : > { %v3294_v3 = vpop.f32.mrf.mxu0  ;;  %v1775_v6 = vadd.f32 1.0, %v3612_v0  ;;  %v3614_v7 = vpop.eup %3613  ;;  %v1804_v23 = vmul.f32 %v1772_v4, %v1548_v12  ;;  %v1806_v30 = vmul.f32 %v1774_v9, %v1550_v17 }
 0x41f   : > { %v1474_v8 = vadd.f32 %v3294_v3, %v4681_v25  ;;  %v1713_v10 = vmul.f32 0.7978846, %v1681_v1  ;;  %3619 = vtanh.f32 %v1715_v2  ;;  %v1773_v16 = vadd.f32 1.0, %v3614_v7 }
 0x420   : > { %v1465_v11 = vpop.f32.mrf.mxu0  ;;  %v1807_v22 = vmul.f32 %v1775_v6, %v1551_v5 }
 0x421   : > { %v1590_v20 = vmul.f32 0.044715, %v1474_v8  ;;  %v1466_v21 = vadd.f32 %v4681_v25, %v1465_v11  ;;  %3621 = vtanh.f32 %v1713_v10  ;;  %v1805_v24 = vmul.f32 %v1773_v16, %v1549_v13 }
 0x422   : > { %v3295_v58 = vpop.f32.mrf.mxu0  ;;  %v1835_v28 = vpack.c.bf16 %v1807_v22, %v1806_v30  ;;  %v4783_v61 = vmul.f32 0.5, %v1474_v8 }
 0x423   : > { %v1622_v14 = vmul.f32 %v1590_v20, %v1474_v8  ;;  %v1588_v15 = vmul.f32 0.044715, %v1466_v21  ;;  %v4757_v27 = vadd.f32 %v3295_v58, %v4681_v25  ;;  %v1834_v31 = vpack.c.bf16 %v1805_v24, %v1804_v23 }
 0x424   : > { %v1468_v54 = vpop.f32.mrf.mxu0 }
 0x425   : > { %v1620_v63 = vmul.f32 %v1588_v15, %v1466_v21  ;;  %v1591_v19 = vmul.f32 0.044715, %v4757_v27  ;;  %v4761_v50 = vadd.f32 %v4681_v25, %v1468_v54  ;;  %v1654_v32 = vmul.f32 %v1622_v14, %v1474_v8  ;;  %3332 = vmatprep.mubr.bf16.mxu1 %v1834_v31 }
 0x426   : > { %v3298_v18 = vpop.f32.mrf.mxu0  ;;  %3333 = vmatmul.mubr.bf16.gmra.mxu1 %v1835_v28 }
 0x427   : > { %v1652_v34 = vmul.f32 %v1620_v63, %v1466_v21  ;;  %v1623_v35 = vmul.f32 %v1591_v19, %v4757_v27  ;;  %v1589_v36 = vmul.f32 0.044715, %v4761_v50  ;;  %v4766_v37 = vadd.f32 %v3298_v18, %v4681_v25 }
 0x428   : > { %v1481_v38 = vpop.f32.mrf.mxu0  ;;  %v3616_v39 = vpop.eup %3615  ;;  %v1686_v51 = vadd.f32 %v1654_v32, %v1474_v8  ;;  %v4794_v8 = vmul.f32 0.5, %v1466_v21 }
 0x429   : > { %v1621_v26 = vmul.f32 %v1589_v36, %v4761_v50  ;;  %v4770_v41 = vadd.f32 %v4681_v25, %v1481_v38  ;;  %v1655_v45 = vmul.f32 %v1623_v35, %v4757_v27  ;;  %v1684_v49 = vadd.f32 %v1652_v34, %v1466_v21 }
 0x42a   : > { %v3618_v44 = vpop.eup %3617  ;;  %v3299_v47 = vpop.f32.mrf.mxu0  ;;  %v1594_v53 = vmul.f32 0.044715, %v4766_v37  ;;  %v1778_v59 = vadd.f32 1.0, %v3616_v39  ;;  %v1718_v9 = vmul.f32 0.7978846, %v1686_v51  ;;  %v4818_v39 = vmul.f32 0.5, %v4757_v27 }
 0x42b   : > { %v1653_v52 = vmul.f32 %v1621_v26, %v4761_v50  ;;  %v1592_v55 = vmul.f32 0.044715, %v4770_v41  ;;  %v4780_v56 = vadd.f32 %v3299_v47, %v4681_v25  ;;  %v1716_v60 = vmul.f32 0.7978846, %v1684_v49 }
 0x42c   : > { %v3620_v33 = vpop.eup %3619  ;;  %v1484_v57 = vpop.f32.mrf.mxu0  ;;  %v1776_v1 = vadd.f32 1.0, %v3618_v44  ;;  %v1687_v46 = vadd.f32 %v1655_v45, %v4757_v27  ;;  %v1626_v6 = vmul.f32 %v1594_v53, %v4766_v37  ;;  %v1810_v22 = vmul.f32 %v1778_v59, %v1554_v43 }
 0x42d   : > { %v1624_v40 = vmul.f32 %v1592_v55, %v4770_v41  ;;  %v1595_v62 = vmul.f32 0.044715, %v4780_v56  ;;  %v4788_v0 = vadd.f32 %v4681_v25, %v1484_v57  ;;  %v1779_v4 = vadd.f32 1.0, %v3620_v33 }
 0x42e   : > { %v3622_v2 = vpop.eup %3621  ;;  %v3302_v3 = vpop.f32.mrf.mxu0  ;;  %v1685_v5 = vadd.f32 %v1653_v52, %v4761_v50  ;;  %3623 = vtanh.f32 %v1716_v60  ;;  %v1808_v24 = vmul.f32 %v1776_v1, %v1552_v42  ;;  %v1719_v21 = vmul.f32 0.7978846, %v1687_v46 }
 0x42f   : > { %v1593_v7 = vmul.f32 0.044715, %v4788_v0  ;;  %v1656_v10 = vmul.f32 %v1624_v40, %v4770_v41  ;;  %v1627_v11 = vmul.f32 %v1595_v62, %v4780_v56  ;;  %v1777_v13 = vadd.f32 1.0, %v3622_v2 }
 0x430   : > { %v1497_v12 = vpop.f32.mrf.mxu0  ;;  %v1717_v16 = vmul.f32 0.7978846, %v1685_v5  ;;  %v1811_v58 = vmul.f32 %v1779_v4, %v1555_v48  ;;  %v1658_v15 = vmul.f32 %v1626_v6, %v4766_v37  ;;  %v4805_v54 = vadd.f32 %v3302_v3, %v4681_v25 }
 0x431   : > { %v1625_v17 = vmul.f32 %v1593_v7, %v4788_v0  ;;  %v4800_v20 = vadd.f32 %v4681_v25, %v1497_v12  ;;  %v1809_v14 = vmul.f32 %v1777_v13, %v1553_v29  ;;  %v1659_v63 = vmul.f32 %v1627_v11, %v4780_v56 }
 0x432   : > { %v3303_v23 = vpop.f32.mrf.mxu0  ;;  %3625 = vtanh.f32 %v1717_v16  ;;  %v1688_v32 = vadd.f32 %v1656_v10, %v4770_v41  ;;  %v1837_v36 = vpack.c.bf16 %v1811_v58, %v1810_v22  ;;  %v1598_v43 = vmul.f32 0.044715, %v4805_v54 }
 0x433   : > { %v1657_v30 = vmul.f32 %v1625_v17, %v4788_v0  ;;  %v1596_v31 = vmul.f32 0.044715, %v4800_v20  ;;  %v1836_v28 = vpack.c.bf16 %v1809_v14, %v1808_v24  ;;  %3627 = vtanh.f32 %v1718_v9 }
 0x434   : > { %v1500_v19 = vpop.f32.mrf.mxu0  ;;  %v4812_v34 = vadd.f32 %v3303_v23, %v4681_v25  ;;  %3629 = vtanh.f32 %v1719_v21  ;;  %v1720_v42 = vmul.f32 0.7978846, %v1688_v32  ;;  %v1690_v27 = vadd.f32 %v1658_v15, %v4766_v37 }
 0x435   : > { %v1628_v18 = vmul.f32 %v1596_v31, %v4800_v20  ;;  %v4815_v35 = vadd.f32 %v4681_v25, %v1500_v19  ;;  %3336 = vmatprep.mubr.bf16.mxu1 %v1836_v28  ;;  %v1689_v26 = vadd.f32 %v1657_v30, %v4788_v0  ;;  %v1691_v51 = vadd.f32 %v1659_v63, %v4780_v56 }
 0x436   : > { %v3306_v38 = vpop.f32.mrf.mxu0  ;;  %3337 = vmatmul.mubr.bf16.gmra.mxu1 %v1837_v36  ;;  %3631 = vtanh.f32 %v1720_v42  ;;  %v1599_v52 = vmul.f32 0.044715, %v4812_v34  ;;  %v1557_v29 = vmul.f32 0.5, %v4761_v50  ;;  %v1722_v59 = vmul.f32 0.7978846, %v1690_v27 }
 0x437   : > { %v1660_v44 = vmul.f32 %v1628_v18, %v4800_v20  ;;  %v1597_v45 = vmul.f32 0.044715, %v4815_v35  ;;  %v4825_v47 = vadd.f32 %v3306_v38, %v4681_v25  ;;  %v1721_v49 = vmul.f32 0.7978846, %v1689_v26 }
 0x438   : > { %v1513_v48 = vpop.f32.mrf.mxu0  ;;  %v1723_v60 = vmul.f32 0.7978846, %v1691_v51  ;;  %v1630_v62 = vmul.f32 %v1598_v43, %v4805_v54  ;;  %v4839_v2 = vmul.f32 0.5, %v4770_v41  ;;  %v4842_v3 = vmul.f32 0.5, %v4766_v37 }
 0x439   : > { %v1629_v53 = vmul.f32 %v1597_v45, %v4815_v35  ;;  %v1602_v55 = vmul.f32 0.044715, %v4825_v47  ;;  %v4833_v33 = vadd.f32 %v4681_v25, %v1513_v48  ;;  %3633 = vtanh.f32 %v1721_v49 }
 0x43a   : > { %v3307_v57 = vpop.f32.mrf.mxu0  ;;  %v4848_v50 = vmul.f32 0.5, %v4788_v0  ;;  %3635 = vtanh.f32 %v1722_v59  ;;  %v1692_v46 = vadd.f32 %v1660_v44, %v4800_v20  ;;  %v1631_v6 = vmul.f32 %v1599_v52, %v4812_v34 }
 0x43b   : > { %v3624_v40 = vpop.eup %3623  ;;  %v1661_v1 = vmul.f32 %v1629_v53, %v4815_v35  ;;  %v4845_v4 = vadd.f32 %v3307_v57, %v4681_v25  ;;  %v1634_v7 = vmul.f32 %v1602_v55, %v4825_v47  ;;  %v1600_v41 = vmul.f32 0.044715, %v4833_v33 }
 0x43c   : > { %v1516_v5 = vpop.f32.mrf.mxu0  ;;  %v1780_v10 = vadd.f32 1.0, %v3624_v40  ;;  %3637 = vtanh.f32 %v1723_v60  ;;  %v1724_v12 = vmul.f32 0.7978846, %v1692_v46  ;;  %v1662_v13 = vmul.f32 %v1630_v62, %v4805_v54 }
 0x43d   : > { %v4855_v9 = vadd.f32 %v4681_v25, %v1516_v5  ;;  %v1693_v11 = vadd.f32 %v1661_v1, %v4815_v35  ;;  %v4864_v22 = vmul.f32 0.5, %v4780_v56  ;;  %v1603_v58 = vmul.f32 0.044715, %v4845_v4 }
 0x43e   : > { %v3310_v37 = vpop.f32.mrf.mxu0  ;;  %3639 = vtanh.f32 %v1724_v12  ;;  %v1663_v15 = vmul.f32 %v1631_v6, %v4812_v34  ;;  %v1666_v30 = vmul.f32 %v1634_v7, %v4825_v47  ;;  %v1632_v31 = vmul.f32 %v1600_v41, %v4833_v33 }
 0x43f   : > { %v3626_v0 = vpop.eup %3625  ;;  %v1601_v16 = vmul.f32 0.044715, %v4855_v9  ;;  %v4861_v17 = vadd.f32 %v3310_v37, %v4681_v25  ;;  %v1725_v14 = vmul.f32 0.7978846, %v1693_v11  ;;  %v1812_v56 = vmul.f32 %v1780_v10, %v4794_v8 }
 0x440   : > { %v1529_v23 = vpop.f32.mrf.mxu0  ;;  %v1781_v24 = vadd.f32 1.0, %v3626_v0  ;;  %v3628_v21 = vpop.eup %3627  ;;  %v1635_v43 = vmul.f32 %v1603_v58, %v4845_v4  ;;  %v1694_v8 = vadd.f32 %v1662_v13, %v4805_v54  ;;  %v1664_v27 = vmul.f32 %v1632_v31, %v4833_v33 }
 0x441   : > { %v4871_v63 = vadd.f32 %v4681_v25, %v1529_v23  ;;  %v1782_v32 = vadd.f32 1.0, %v3628_v21  ;;  %3641 = vtanh.f32 %v1725_v14  ;;  %v3630_v18 = vpop.eup %3629  ;;  %v1633_v36 = vmul.f32 %v1601_v16, %v4855_v9 }
 0x442   : > { %v3311_v19 = vpop.f32.mrf.mxu0  ;;  %v1813_v28 = vmul.f32 %v1781_v24, %v1557_v29  ;;  %v1606_v38 = vmul.f32 0.044715, %v4861_v17  ;;  %v1783_v48 = vadd.f32 1.0, %v3630_v18  ;;  %v1695_v29 = vadd.f32 %v1663_v15, %v4812_v34 }
 0x443   : > { %v1604_v26 = vmul.f32 0.044715, %v4871_v63  ;;  %v4878_v42 = vadd.f32 %v3311_v19, %v4681_v25  ;;  %v3632_v49 = vpop.eup %3631  ;;  %v1814_v53 = vmul.f32 %v1782_v32, %v4783_v61  ;;  %v1726_v59 = vmul.f32 0.7978846, %v1694_v8 }
 0x444   : > { %v1532_v44 = vpop.f32.mrf.mxu0  ;;  %v1838_v45 = vpack.c.bf16 %v1813_v28, %v1812_v56  ;;  %v1815_v55 = vmul.f32 %v1783_v48, %v4818_v39  ;;  %v1784_v57 = vadd.f32 1.0, %v3632_v49  ;;  %v1665_v40 = vmul.f32 %v1633_v36, %v4855_v9 }
 0x445   : > { %v1607_v51 = vmul.f32 0.044715, %v4878_v42  ;;  %v4885_v52 = vadd.f32 %v4681_v25, %v1532_v44  ;;  %v1638_v62 = vmul.f32 %v1606_v38, %v4861_v17  ;;  %v1636_v1 = vmul.f32 %v1604_v26, %v4871_v63 }
 0x446   : > { %3340 = vmatprep.mubr.bf16.mxu1 %v1838_v45  ;;  %v3634_v60 = vpop.eup %3633  ;;  %v1667_v25 = vmul.f32 %v1635_v43, %v4845_v4  ;;  %v1839_v46 = vpack.c.bf16 %v1815_v55, %v1814_v53  ;;  %v1727_v6 = vmul.f32 0.7978846, %v1695_v29  ;;  %v1816_v37 = vmul.f32 %v1784_v57, %v4839_v2 }
 0x447   : > { %v1605_v5 = vmul.f32 0.044715, %v4885_v52  ;;  %v1785_v61 = vadd.f32 1.0, %v3634_v60  ;;  %v3636_v7 = vpop.eup %3635  ;;  %v1639_v39 = vmul.f32 %v1607_v51, %v4878_v42  ;;  %3643 = vtanh.f32 %v1726_v59 }
 0x448   : > { %3341 = vmatmul.mubr.bf16.gmra.mxu1 %v1839_v46  ;;  %v1786_v11 = vadd.f32 1.0, %v3636_v7  ;;  %3645 = vtanh.f32 %v1727_v6  ;;  %v1696_v12 = vadd.f32 %v1664_v27, %v4833_v33  ;;  %v1670_v13 = vmul.f32 %v1638_v62, %v4861_v17 }
 0x449   : > { %v1637_v41 = vmul.f32 %v1605_v5, %v4885_v52  ;;  %v1817_v10 = vmul.f32 %v1785_v61, %v4848_v50  ;;  %v3638_v0 = vpop.eup %3637  ;;  %v1668_v16 = vmul.f32 %v1636_v1, %v4871_v63  ;;  %v1564_v58 = vmul.f32 0.5, %v4800_v20 }
 0x44a   : > { %v1697_v23 = vadd.f32 %v1665_v40, %v4855_v9  ;;  %v1787_v14 = vadd.f32 1.0, %v3638_v0  ;;  %v1728_v21 = vmul.f32 0.7978846, %v1696_v12  ;;  %v1671_v50 = vmul.f32 %v1639_v39, %v4878_v42 }
 0x44b   : > { %v1669_v24 = vmul.f32 %v1637_v41, %v4885_v52  ;;  %v1840_v2 = vpack.c.bf16 %v1817_v10, %v1816_v37  ;;  %v3640_v15 = vpop.eup %3639  ;;  %v1698_v19 = vadd.f32 %v1666_v30, %v4825_v47  ;;  %v1699_v56 = vadd.f32 %v1667_v25, %v4845_v4 }
 0x44c   : > { %v1729_v31 = vmul.f32 0.7978846, %v1697_v23  ;;  %v1818_v28 = vmul.f32 %v1786_v11, %v4842_v3  ;;  %v1819_v20 = vmul.f32 %v1787_v14, %v4864_v22  ;;  %v1788_v32 = vadd.f32 1.0, %v3640_v15 }
 0x44d   : > { %3344 = vmatprep.mubr.bf16.mxu1 %v1840_v2  ;;  %3647 = vtanh.f32 %v1728_v21  ;;  %v1730_v36 = vmul.f32 0.7978846, %v1698_v19  ;;  %v1731_v38 = vmul.f32 0.7978846, %v1699_v56  ;;  %v1700_v26 = vadd.f32 %v1668_v16, %v4871_v63 }
 0x44e   : > { %v3642_v18 = vpop.eup %3641  ;;  %3649 = vtanh.f32 %v1729_v31  ;;  %v1841_v43 = vpack.c.bf16 %v1819_v20, %v1818_v28  ;;  %v1565_v44 = vmul.f32 0.5, %v4815_v35  ;;  %v1701_v30 = vadd.f32 %v1669_v24, %v4885_v52 }
 0x44f   : > { %v1789_v45 = vadd.f32 1.0, %v3642_v18  ;;  %v1820_v48 = vmul.f32 %v1788_v32, %v1564_v58  ;;  %3651 = vtanh.f32 %v1730_v36  ;;  %v1732_v8 = vmul.f32 0.7978846, %v1700_v26  ;;  %v4927_v36 = vld [vmem:[%s5187_s21] ss:$0 sm:$0xff] }
 0x450   : > { %3345 = vmatmul.mubr.bf16.gmra.mxu1 %v1841_v43  ;;  %3653 = vtanh.f32 %v1731_v38  ;;  %v1733_v22 = vmul.f32 0.7978846, %v1701_v30  ;;  %v1702_v49 = vadd.f32 %v1670_v13, %v4861_v17  ;;  %v1703_v27 = vadd.f32 %v1671_v50, %v4878_v42 }
 0x451   : > { %v1821_v3 = vmul.f32 %v1789_v45, %v1565_v44  ;;  %3655 = vtanh.f32 %v1732_v8  ;;  %v1566_v59 = vmul.f32 0.5, %v4805_v54  ;;  %v1567_v60 = vmul.f32 0.5, %v4812_v34 }
 0x452   : > { %3657 = vtanh.f32 %v1733_v22  ;;  %v1734_v53 = vmul.f32 0.7978846, %v1702_v49  ;;  %v1735_v55 = vmul.f32 0.7978846, %v1703_v27  ;;  %v1568_v6 = vmul.f32 0.5, %v4833_v33 }
 0x453   : > { %v1842_v51 = vpack.c.bf16 %v1821_v3, %v1820_v48  ;;  %v1569_v7 = vmul.f32 0.5, %v4855_v9  ;;  %v1570_v34 = vmul.f32 0.5, %v4825_v47  ;;  %v1571_v0 = vmul.f32 0.5, %v4845_v4 }
 0x454   : > { %v3644_v35 = vpop.eup %3643  ;;  %3659 = vtanh.f32 %v1734_v53  ;;  %v1572_v23 = vmul.f32 0.5, %v4871_v63  ;;  %v1573_v2 = vmul.f32 0.5, %v4885_v52  ;;  %v1575_v56 = vmul.f32 0.5, %v4878_v42 }
 0x455   : > { %3348 = vmatprep.mubr.bf16.mxu1 %v1842_v51  ;;  %v3646_v57 = vpop.eup %3645  ;;  %v1790_v29 = vadd.f32 1.0, %v3644_v35  ;;  %3661 = vtanh.f32 %v1735_v55  ;;  %v1574_v63 = vmul.f32 0.5, %v4861_v17 }
 0x456   : > { %v1791_v40 = vadd.f32 1.0, %v3646_v57 }
 0x457   : > { %v1822_v62 = vmul.f32 %v1790_v29, %v1566_v59 }
 0x458   : > { %v1823_v1 = vmul.f32 %v1791_v40, %v1567_v60 }
 0x45a   : > { %v3648_v5 = vpop.eup %3647  ;;  %v1843_v46 = vpack.c.bf16 %v1823_v1, %v1822_v62 }
 0x45b   : > { %v3650_v25 = vpop.eup %3649  ;;  %v1792_v61 = vadd.f32 1.0, %v3648_v5 }
 0x45c   : > { %v1793_v39 = vadd.f32 1.0, %v3650_v25  ;;  %v3652_v41 = vpop.eup %3651  ;;  %3349 = vmatmul.mubr.bf16.gmra.mxu1 %v1843_v46 }
 0x45d   : > { %v3654_v37 = vpop.eup %3653  ;;  %v1824_v10 = vmul.f32 %v1792_v61, %v1568_v6  ;;  %v1794_v54 = vadd.f32 1.0, %v3652_v41 }
 0x45e   : > { %v1825_v11 = vmul.f32 %v1793_v39, %v1569_v7  ;;  %v3656_v12 = vpop.eup %3655  ;;  %v1795_v13 = vadd.f32 1.0, %v3654_v37 }
 0x45f   : > { %v3658_v16 = vpop.eup %3657  ;;  %v1796_v33 = vadd.f32 1.0, %v3656_v12  ;;  %v1826_v24 = vmul.f32 %v1794_v54, %v1570_v34 }
 0x460   : > { %v1844_v58 = vpack.c.bf16 %v1825_v11, %v1824_v10  ;;  %v1827_v9 = vmul.f32 %v1795_v13, %v1571_v0  ;;  %v1797_v14 = vadd.f32 1.0, %v3658_v16 }
 0x461   : > { %v3660_v21 = vpop.eup %3659  ;;  %v1828_v31 = vmul.f32 %v1796_v33, %v1572_v23 }
 0x462   : > { %3352 = vmatprep.mubr.bf16.mxu1 %v1844_v58  ;;  %v3662_v15 = vpop.eup %3661  ;;  %v1845_v50 = vpack.c.bf16 %v1827_v9, %v1826_v24  ;;  %v1829_v47 = vmul.f32 %v1797_v14, %v1573_v2  ;;  %v1798_v28 = vadd.f32 1.0, %v3660_v21 }
 0x463   : > { %v1799_v19 = vadd.f32 1.0, %v3662_v15 }
 0x464   : > { %3353 = vmatmul.mubr.bf16.gmra.mxu1 %v1845_v50  ;;  %v1846_v4 = vpack.c.bf16 %v1829_v47, %v1828_v31  ;;  %v1830_v32 = vmul.f32 %v1798_v28, %v1574_v63 }
 0x465   : > { %v1831_v20 = vmul.f32 %v1799_v19, %v1575_v56 }
 0x466   : > { %3356 = vmatprep.mubr.bf16.mxu1 %v1846_v4 }
 0x467   : > { %v1847_v52 = vpack.c.bf16 %v1831_v20, %v1830_v32 }
 0x46c   : > { %3357 = vmatmul.mubr.bf16.gmra.mxu1 %v1847_v52 }
 0x4d6   : > { %v3330_v18 = vpop.f32.mrf.mxu1 }
 0x4d7   : > { %v1962_v45 = vadd.f32 %v3330_v18, %v4927_v36 }
 0x4d8   : > { %v1953_v38 = vpop.f32.mrf.mxu1 }
 0x4d9   : > { %v1954_v26 = vadd.f32 %v4927_v36, %v1953_v38  ;;  %v2144_v38 = vlaneseq }
 0x4da   : > { %v3331_v43 = vpop.f32.mrf.mxu1 }
 0x4db   : > { %2080 = vxpose.xlu0.b32.start [1/16] (narrow) %v1954_v26, 16  ;;  %v1965_v17 = vadd.f32 %v3331_v43, %v4927_v36  ;;  %v2145_v26 = vand.u32 127, %v2144_v38 }
 0x4dc   : > { %v1956_v44 = vpop.f32.mrf.mxu1 }
 0x4dd   : > { %v1957_v42 = vadd.f32 %v4927_v36, %v1956_v44  ;;  %vm2146_vm2 = vcmp.lt.s32.totalorder %v2145_v26, 32 }
 0x4df   : > { %2081 = vxpose.xlu0.b32.cont [2/16] (narrow) %v1957_v42, 16  ;;  %v3675_v42 = vld [vmem:[#allocation2 + $0x10] sm:$0xff] }
 0x4e3   : > { %2082 = vxpose.xlu0.b32.cont [3/16] (narrow) %v1962_v45, 16 }
 0x4e6   : > { %v3334_v30 = vpop.f32.mrf.mxu1 }
 0x4e7   : > { %2083 = vxpose.xlu0.b32.cont [4/16] (narrow) %v1965_v17, 16  ;;  %v1978_v27 = vadd.f32 %v3334_v30, %v4927_v36 }
 0x4e8   : > { %v1969_v48 = vpop.f32.mrf.mxu1 }
 0x4e9   : > { %v1970_v8 = vadd.f32 %v4927_v36, %v1969_v48 }
 0x4ea   : > { %v3335_v3 = vpop.f32.mrf.mxu1 }
 0x4eb   : > { %2084 = vxpose.xlu0.b32.cont [5/16] (narrow) %v1970_v8, 16  ;;  %v1981_v51 = vadd.f32 %v3335_v3, %v4927_v36 }
 0x4ec   : > { %v1972_v22 = vpop.f32.mrf.mxu1 }
 0x4ed   : > { %v1973_v49 = vadd.f32 %v4927_v36, %v1972_v22 }
 0x4ef   : > { %2085 = vxpose.xlu0.b32.cont [6/16] (narrow) %v1973_v49, 16 }
 0x4f3   : > { %2086 = vxpose.xlu0.b32.cont [7/16] (narrow) %v1978_v27, 16  ;;  %v3677_v27 = vld [vmem:[#allocation2 + $0x18] sm:$0xff] }
 0x4f6   : > { %v3338_v53 = vpop.f32.mrf.mxu1 }
 0x4f7   : > { %2087 = vxpose.xlu0.b32.cont [8/16] (narrow) %v1981_v51, 16  ;;  %v1994_v60 = vadd.f32 %v3338_v53, %v4927_v36 }
 0x4f8   : > { %v1985_v55 = vpop.f32.mrf.mxu1 }
 0x4f9   : > { %v1986_v35 = vadd.f32 %v4927_v36, %v1985_v55 }
 0x4fa   : > { %v3339_v57 = vpop.f32.mrf.mxu1 }
 0x4fb   : > { %2088 = vxpose.xlu0.b32.cont [9/16] (narrow) %v1986_v35, 16  ;;  %v1997_v40 = vadd.f32 %v3339_v57, %v4927_v36  ;;  %v3678_v35 = vld [vmem:[#allocation2 + $0x8] sm:$0xff] }
 0x4fc   : > { %v1988_v29 = vpop.f32.mrf.mxu1 }
 0x4fd   : > { %v1989_v59 = vadd.f32 %v4927_v36, %v1988_v29 }
 0x4ff   : > { %2089 = vxpose.xlu0.b32.cont [10/16] (narrow) %v1989_v59, 16  ;;  %v3579_v59 = vld [vmem:[%s4610_s30 + $0x38] sm:$0xff]  }
 0x500   : > { %3360 = vmatprep.subr.bf16.mxu0 %v3579_v59 }
 0x501   : > { %3361 = vmatpush3.bf16.msra.mxu0 %v3579_v59 }
 0x503   : > { %2090 = vxpose.xlu0.b32.cont [11/16] (narrow) %v1994_v60, 16  ;;  %v3580_v60 = vld [vmem:[%s4610_s30 + $0x30] sm:$0xff]  }
 0x504   : > { %3362 = vmatprep.subr.bf16.mxu0 %v3580_v60 }
 0x505   : > { %3363 = vmatpush3.bf16.msra.mxu0 %v3580_v60 }
 0x507   : > { %2091 = vxpose.xlu0.b32.cont [12/16] (narrow) %v1997_v40, 16 }
 0x508   : > { %v3342_v62 = vpop.f32.mrf.mxu1 }
 0x509   : > { %v2010_v39 = vadd.f32 %v3342_v62, %v4927_v36  ;;  %v3581_v62 = vld [vmem:[%s4610_s30 + $0x28] sm:$0xff]  }
 0x50a   : > { %v2001_v1 = vpop.f32.mrf.mxu1  ;;  %3364 = vmatprep.subr.bf16.mxu0 %v3581_v62 }
 0x50b   : > { %v2002_v5 = vadd.f32 %v4927_v36, %v2001_v1  ;;  %3365 = vmatpush3.bf16.msra.mxu0 %v3581_v62  ;;  %v3582_v1 = vld [vmem:[%s4610_s30 + $0x20] sm:$0xff]  }
 0x50c   : > { %v3343_v25 = vpop.f32.mrf.mxu1  ;;  %3366 = vmatprep.subr.bf16.mxu0 %v3582_v1 }
 0x50d   : > { %2092 = vxpose.xlu0.b32.cont [13/16] (narrow) %v2002_v5, 16  ;;  %v2013_v11 = vadd.f32 %v3343_v25, %v4927_v36  ;;  %v3583_v5 = vld [vmem:[%s4610_s30 + $0x18] sm:$0xff]   ;;  %v3584_v25 = vld [vmem:[%s4610_s30 + $0x10] sm:$0xff]  }
 0x50e   : > { %v2004_v46 = vpop.f32.mrf.mxu1 }
 0x50f   : > { %v2005_v61 = vadd.f32 %v4927_v36, %v2004_v46  ;;  %3367 = vmatpush3.bf16.msra.mxu0 %v3582_v1  ;;  %v3585_v46 = vld [vmem:[%s4610_s30 + $0x8] sm:$0xff]  }
 0x510   : > { %v3346_v6 = vpop.f32.mrf.mxu1  ;;  %3368 = vmatprep.subr.bf16.mxu0 %v3583_v5 }
 0x511   : > { %2093 = vxpose.xlu0.b32.cont [14/16] (narrow) %v2005_v61, 16  ;;  %v2026_v12 = vadd.f32 %v3346_v6, %v4927_v36  ;;  %v3586_v61 = vld [vmem:[%s4610_s30] sm:$0xff]  }
 0x512   : > { %v2017_v7 = vpop.f32.mrf.mxu1  ;;  %v3587_v6 = vld [vmem:[%s4589_s7 + $0x38] sm:$0xff]  }
 0x513   : > { %v2018_v41 = vadd.f32 %v4927_v36, %v2017_v7  ;;  %3369 = vmatpush3.bf16.msra.mxu0 %v3583_v5  ;;  %v3588_v7 = vld [vmem:[%s4589_s7 + $0x30] sm:$0xff]   ;;  %3380 = vmatprep.subr.bf16.mxu1 %v3587_v6 }
 0x514   : > { %v3347_v37 = vpop.f32.mrf.mxu1  ;;  %3370 = vmatprep.subr.bf16.mxu0 %v3584_v25  ;;  %3381 = vmatpush3.bf16.msra.mxu1 %v3587_v6 }
 0x515   : > { %2094 = vxpose.xlu0.b32.cont [15/16] (narrow) %v2010_v39, 16  ;;  %2112 = vxpose.xlu1.b32.start [1/16] (narrow) %v2018_v41, 16  ;;  %v2029_v13 = vadd.f32 %v3347_v37, %v4927_v36  ;;  %v3589_v39 = vld [vmem:[%s4589_s7 + $0x28] sm:$0xff]   ;;  %v3590_v41 = vld [vmem:[%s4589_s7 + $0x20] sm:$0xff]  }
 0x516   : > { %v2020_v10 = vpop.f32.mrf.mxu1  ;;  %3382 = vmatprep.subr.bf16.mxu1 %v3588_v7 }
 0x517   : > { %v2021_v54 = vadd.f32 %v4927_v36, %v2020_v10  ;;  %3371 = vmatpush3.bf16.msra.mxu0 %v3584_v25 }
 0x518   : > { %3372 = vmatprep.subr.bf16.mxu0 %v3585_v46  ;;  %3383 = vmatpush3.bf16.msra.mxu1 %v3588_v7 }
 0x519   : > { %2095 = vxpose.xlu0.b32.end [16/16] (narrow) %v2013_v11, 16  ;;  %2113 = vxpose.xlu1.b32.cont [2/16] (narrow) %v2021_v54, 16 }
 0x51a   : > { %3384 = vmatprep.subr.bf16.mxu1 %v3589_v39 }
 0x51b   : > { %3373 = vmatpush3.bf16.msra.mxu0 %v3585_v46 }
 0x51c   : > { %v3350_v34 = vpop.f32.mrf.mxu1  ;;  %3374 = vmatprep.subr.bf16.mxu0 %v3586_v61  ;;  %3385 = vmatpush3.bf16.msra.mxu1 %v3589_v39 }
 0x51d   : > { %2114 = vxpose.xlu1.b32.cont [3/16] (narrow) %v2026_v12, 16  ;;  %v2042_v9 = vadd.f32 %v3350_v34, %v4927_v36  ;;  %3386 = vmatprep.subr.bf16.mxu1 %v3590_v41 }
 0x51e   : > { %v2033_v0 = vpop.f32.mrf.mxu1 }
 0x51f   : > { %v2034_v58 = vadd.f32 %v4927_v36, %v2033_v0  ;;  %3375 = vmatpush3.bf16.msra.mxu0 %v3586_v61 }
 0x520   : > { %v3351_v16 = vpop.f32.mrf.mxu1  ;;  %3387 = vmatpush3.bf16.msra.mxu1 %v3590_v41 }
 0x521   : > { %2115 = vxpose.xlu1.b32.cont [4/16] (narrow) %v2029_v13, 16  ;;  %v2045_v14 = vadd.f32 %v3351_v16, %v4927_v36 }
 0x522   : > { %v2036_v23 = vpop.f32.mrf.mxu1 }
 0x523   : > { %v2037_v33 = vadd.f32 %v4927_v36, %v2036_v23 }
 0x524   : > { %v3354_v24 = vpop.f32.mrf.mxu1 }
 0x525   : > { %2116 = vxpose.xlu1.b32.cont [5/16] (narrow) %v2034_v58, 16  ;;  %v2058_v19 = vadd.f32 %v3354_v24, %v4927_v36 }
 0x526   : > { %v2049_v2 = vpop.f32.mrf.mxu1 }
 0x527   : > { %v2050_v15 = vadd.f32 %v4927_v36, %v2049_v2 }
 0x528   : > { %v3355_v21 = vpop.f32.mrf.mxu1 }
 0x529   : > { %2117 = vxpose.xlu1.b32.cont [6/16] (narrow) %v2037_v33, 16  ;;  %v2061_v56 = vadd.f32 %v3355_v21, %v4927_v36 }
 0x52a   : > { %v2052_v50 = vpop.f32.mrf.mxu1 }
 0x52b   : > { %v2053_v31 = vadd.f32 %v4927_v36, %v2052_v50 }
 0x52c   : > { %v3358_v47 = vpop.f32.mrf.mxu1 }
 0x52d   : > { %2118 = vxpose.xlu1.b32.cont [7/16] (narrow) %v2042_v9, 16  ;;  %v2074_v52 = vadd.f32 %v3358_v47, %v4927_v36 }
 0x52e   : > { %v2065_v4 = vpop.f32.mrf.mxu1 }
 0x52f   : > { %v2066_v63 = vadd.f32 %v4927_v36, %v2065_v4 }
 0x530   : > { %v3359_v28 = vpop.f32.mrf.mxu1 }
 0x531   : > { %2119 = vxpose.xlu1.b32.cont [8/16] (narrow) %v2045_v14, 16  ;;  %v2077_v18 = vadd.f32 %v3359_v28, %v4927_v36 }
 0x532   : > { %v2068_v20 = vpop.f32.mrf.mxu1 }
 0x533   : > { %v2069_v32 = vadd.f32 %v4927_v36, %v2068_v20  ;;  %v3676_v36 = vld [vmem:[#allocation2] sm:$0xff] }
 0x534   : > { %v3186_v20 = vld [vmem:[%s5188_s26] sm:$0xff]  }
 0x535   : > { %2120 = vxpose.xlu1.b32.cont [9/16] (narrow) %v2050_v15, 16 }
 0x539   : > { %2121 = vxpose.xlu1.b32.cont [10/16] (narrow) %v2053_v31, 16 }
 0x53d   : > { %2122 = vxpose.xlu1.b32.cont [11/16] (narrow) %v2058_v19, 16 }
 0x541   : > { %2123 = vxpose.xlu1.b32.cont [12/16] (narrow) %v2061_v56, 16 }
 0x545   : > { %2124 = vxpose.xlu1.b32.cont [13/16] (narrow) %v2066_v63, 16 }
 0x549   : > { %2125 = vxpose.xlu1.b32.cont [14/16] (narrow) %v2069_v32, 16 }
 0x54d   : > { %2126 = vxpose.xlu1.b32.cont [15/16] (narrow) %v2074_v52, 16  ;;  %v3190_v52 = vld [vmem:[%s5189_s27] sm:$0xff]  }
 0x551   : > { %2127 = vxpose.xlu1.b32.end [16/16] (narrow) %v2077_v18, 16 }
 0x559   : > { %v2096_v43 = vpop.trf.xlu0 }
 0x55a   : > { %v2149_v44 = vsel %vm2146_vm2, %v2096_v43, 0.0 }
 0x55b   : > { %v4962_v45 = vadd.f32 %v3675_v42, %v2149_v44  ;;  %v3187_v44 = vunpack.c.l.bf16 %v3186_v20  ;;  %v3188_v42 = vunpack.c.h.bf16 %v3186_v20 }
 0x55d   : > { %2165 = vadd.xlane.f32.xlu0 %v4962_v45  ;;  %v2187_v17 = vmul.f32 %v4962_v45, %v4962_v45  ;;  %v2097_v30 = vpop.trf.xlu0 }
 0x55e   : > { %v2150_v48 = vsel %vm2146_vm2, %v2097_v30, 0.0 }
 0x55f   : > { %v4968_v8 = vadd.f32 %v3676_v36, %v2150_v48  ;;  %v3191_v36 = vunpack.c.l.bf16 %v3190_v52 }
 0x561   : > { %2191 = vadd.xlane.f32.xlu0 %v2187_v17  ;;  %v2188_v3 = vmul.f32 %v4968_v8, %v4968_v8 }
 0x578   : > { %2167 = vadd.xlane.f32.xlu1 %v4968_v8 }
 0x57c   : > { %2193 = vadd.xlane.f32.xlu1 %v2188_v3  ;;  %v3192_v3 = vunpack.c.h.bf16 %v3190_v52 }
 0x591   : > { %v2128_v22 = vpop.trf.xlu1 }
 0x592   : > { %v2151_v49 = vsel %vm2146_vm2, %v2128_v22, 0.0 }
 0x593   : > { %v4974_v51 = vadd.f32 %v3677_v27, %v2151_v49 }
 0x595   : > { %2169 = vadd.xlane.f32.xlu0 %v4974_v51  ;;  %v2129_v53 = vpop.trf.xlu1  ;;  %v2189_v29 = vmul.f32 %v4974_v51, %v4974_v51 }
 0x596   : > { %v2152_v55 = vsel %vm2146_vm2, %v2129_v53, 0.0 }
 0x597   : > { %v4978_v57 = vadd.f32 %v3678_v35, %v2152_v55 }
 0x599   : > { %2195 = vadd.xlane.f32.xlu0 %v2189_v29  ;;  %2171 = vadd.xlane.f32.xlu1 %v4978_v57  ;;  %v2190_v40 = vmul.f32 %v4978_v57, %v4978_v57 }
 0x59d   : > { %2197 = vadd.xlane.f32.xlu1 %v2190_v40 }
 0x5e6   : > { %v2166_v37 = vpop.xlane.xlu0 %2165 }
 0x5ea   : > { %v2192_v54 = vpop.xlane.xlu0 %2191 }
 0x601   : > { %v2168_v10 = vpop.xlane.xlu1 %2167 }
 0x602   : > { %v2173_v11 = vadd.f32 %v2168_v10, %v2166_v37 }
 0x604   : > { %v2174_v12 = vrot.slane %v2173_v11, 4 }
 0x605   : > { %v2194_v34 = vpop.xlane.xlu1 %2193 }
 0x606   : > { %v2175_v0 = vadd.f32 %v2174_v12, %v2173_v11  ;;  %v2199_v13 = vadd.f32 %v2194_v34, %v2192_v54 }
 0x608   : > { %v2176_v16 = vrot.slane %v2175_v0, 2  ;;  %v2200_v58 = vrot.slane %v2199_v13, 4 }
 0x60a   : > { %v2177_v23 = vadd.f32 %v2176_v16, %v2175_v0  ;;  %v2201_v33 = vadd.f32 %v2200_v58, %v2199_v13 }
 0x60c   : > { %v2178_v24 = vrot.slane %v2177_v23, 1  ;;  %v2202_v9 = vrot.slane %v2201_v33, 2 }
 0x60e   : > { %v2179_v2 = vadd.f32 %v2178_v24, %v2177_v23  ;;  %v2203_v14 = vadd.f32 %v2202_v9, %v2201_v33  ;;  %v3591_v24 = vld [vmem:[%s4589_s7 + $0x18] sm:$0xff]   ;;  %v3592_v9 = vld [vmem:[%s4589_s7 + $0x10] sm:$0xff]  }
 0x60f   : > { %3388 = vmatprep.subr.bf16.mxu1 %v3591_v24 }
 0x610   : > { %v2213_v21 = vmul.f32 0.001953125, %v2179_v2  ;;  %v2204_v15 = vrot.slane %v2203_v14, 1  ;;  %3389 = vmatpush3.bf16.msra.mxu1 %v3591_v24  ;;  %v3593_v2 = vld [vmem:[%s4589_s7 + $0x8] sm:$0xff]  }
 0x611   : > { %3390 = vmatprep.subr.bf16.mxu1 %v3592_v9 }
 0x612   : > { %v2217_v50 = vmul.f32 %v2213_v21, %v2213_v21  ;;  %v2205_v31 = vadd.f32 %v2204_v15, %v2203_v14  ;;  %v2221_v18 = vsub.f32 %v4962_v45, %v2213_v21  ;;  %v2222_v38 = vsub.f32 %v4968_v8, %v2213_v21  ;;  %v3594_v14 = vld [vmem:[%s4589_s7] sm:$0xff]   ;;  %v3137_v21 = vld [vmem:[%s5190_s20] ss:$0 sm:$0xff] }
 0x614   : > { %v2215_v47 = vmul.f32 0.001953125, %v2205_v31  ;;  %3391 = vmatpush3.bf16.msra.mxu1 %v3592_v9 }
 0x615   : > { %3392 = vmatprep.subr.bf16.mxu1 %v3593_v2 }
 0x616   : > { %v2219_v19 = vsub.f32 %v2215_v47, %v2217_v50 }
 0x618   : > { %v2225_v4 = vadd.f32 1e-05, %v2219_v19  ;;  %3393 = vmatpush3.bf16.msra.mxu1 %v3593_v2 }
 0x619   : > { %3394 = vmatprep.subr.bf16.mxu1 %v3594_v14 }
 0x61a   : > { %3663 = vrsqrt.f32 %v2225_v4 }
 0x61c   : > { %3395 = vmatpush3.bf16.msra.mxu1 %v3594_v14 }
 0x61e   : > { %v2170_v56 = vpop.xlane.xlu0 %2169 }
 0x622   : > { %v2172_v28 = vpop.xlane.xlu1 %2171  ;;  %v2196_v26 = vpop.xlane.xlu0 %2195 }
 0x623   : > { %v2180_v63 = vadd.f32 %v2172_v28, %v2170_v56 }
 0x625   : > { %v2181_v32 = vrot.slane %v2180_v63, 4 }
 0x626   : > { %v2198_v43 = vpop.xlane.xlu1 %2197 }
 0x627   : > { %v3664_v17 = vpop.eup %3663  ;;  %v2182_v30 = vadd.f32 %v2181_v32, %v2180_v63  ;;  %v2206_v48 = vadd.f32 %v2198_v43, %v2196_v26 }
 0x628   : > { %v2229_v22 = vmul.f32 %v3664_v17, %v2221_v18  ;;  %v2230_v49 = vmul.f32 %v3664_v17, %v2222_v38 }
 0x629   : > { %v2183_v27 = vrot.slane %v2182_v30, 2  ;;  %v2207_v53 = vrot.slane %v2206_v48, 4 }
 0x62a   : > { %v2233_v55 = vmul.f32 %v3187_v44, %v2229_v22  ;;  %v2234_v35 = vmul.f32 %v3188_v42, %v2230_v49 }
 0x62b   : > { %v2184_v29 = vadd.f32 %v2183_v27, %v2182_v30  ;;  %v2208_v59 = vadd.f32 %v2207_v53, %v2206_v48 }
 0x62c   : > { %v2237_v60 = vadd.f32 %v3191_v36, %v2233_v55  ;;  %v2238_v40 = vadd.f32 %v3192_v3, %v2234_v35 }
 0x62d   : > { %v2185_v62 = vrot.slane %v2184_v29, 1  ;;  %v2209_v1 = vrot.slane %v2208_v59, 2 }
 0x62e   : > { %v2241_v5 = vpack.c.bf16 %v2238_v40, %v2237_v60 }
 0x62f   : > { %v2186_v25 = vadd.f32 %v2185_v62, %v2184_v29  ;;  %v2210_v46 = vadd.f32 %v2209_v1, %v2208_v59 }
 0x630   : > { %3376 = vmatprep.mubr.bf16.mxu0 %v2241_v5 }
 0x631   : > { %v2214_v61 = vmul.f32 0.001953125, %v2186_v25  ;;  %v2211_v6 = vrot.slane %v2210_v46, 1 }
 0x633   : > { %v2212_v7 = vadd.f32 %v2211_v6, %v2210_v46  ;;  %v2218_v39 = vmul.f32 %v2214_v61, %v2214_v61  ;;  %v2223_v11 = vsub.f32 %v4974_v51, %v2214_v61  ;;  %v2224_v54 = vsub.f32 %v4978_v57, %v2214_v61 }
 0x635   : > { %v2216_v41 = vmul.f32 0.001953125, %v2212_v7 }
 0x637   : > { %v2220_v37 = vsub.f32 %v2216_v41, %v2218_v39 }
 0x639   : > { %v2226_v10 = vadd.f32 1e-05, %v2220_v37 }
 0x63b   : > { %3665 = vrsqrt.f32 %v2226_v10 }
 0x648   : > { %v3666_v12 = vpop.eup %3665 }
 0x649   : > { %v2231_v34 = vmul.f32 %v3666_v12, %v2223_v11  ;;  %v2232_v0 = vmul.f32 %v3666_v12, %v2224_v54  ;;  %v3146_v54 = vld [vmem:[%s5191_s11] ss:$0 sm:$0xff] }
 0x64b   : > { %v2235_v13 = vmul.f32 %v3187_v44, %v2231_v34  ;;  %v2236_v16 = vmul.f32 %v3188_v42, %v2232_v0 }
 0x64d   : > { %v2239_v58 = vadd.f32 %v3191_v36, %v2235_v13  ;;  %v2240_v23 = vadd.f32 %v3192_v3, %v2236_v16 }
 0x64f   : > { %v2242_v33 = vpack.c.bf16 %v2240_v23, %v2239_v58 }
 0x651   : > { %3377 = vmatmul.mubr.bf16.vlgmr.msra.gmra.mxu0 %v2242_v33 }
 0x711   : > { %v3378_v15 = vpop.f32.mrf.mxu0 }
 0x712   : > { %v2357_v50 = vadd.f32 %v3378_v15, %v3137_v21 }
 0x713   : > { %v2348_v31 = vpop.f32.mrf.mxu0 }
 0x714   : > { %v2369_v47 = vmul.f32 0.044715, %v2357_v50  ;;  %v2349_v19 = vadd.f32 %v3137_v21, %v2348_v31  ;;  %v2365_v6 = vmul.f32 0.5, %v2357_v50 }
 0x715   : > { %v3379_v4 = vpop.f32.mrf.mxu0 }
 0x716   : > { %v2373_v56 = vmul.f32 %v2369_v47, %v2357_v50  ;;  %v2367_v28 = vmul.f32 0.044715, %v2349_v19  ;;  %v2360_v63 = vadd.f32 %v3379_v4, %v3137_v21  ;;  %v2363_v25 = vmul.f32 0.5, %v2349_v19 }
 0x717   : > { %v2351_v20 = vpop.f32.mrf.mxu0 }
 0x718   : > { %v2377_v32 = vmul.f32 %v2373_v56, %v2357_v50  ;;  %v2371_v52 = vmul.f32 %v2367_v28, %v2349_v19  ;;  %v2370_v18 = vmul.f32 0.044715, %v2360_v63  ;;  %v2352_v38 = vadd.f32 %v3137_v21, %v2351_v20 }
 0x719   : > { %v2366_v1 = vmul.f32 0.5, %v2360_v63 }
 0x71a   : > { %v2381_v26 = vadd.f32 %v2377_v32, %v2357_v50  ;;  %v2375_v43 = vmul.f32 %v2371_v52, %v2349_v19  ;;  %v2374_v44 = vmul.f32 %v2370_v18, %v2360_v63  ;;  %v2368_v42 = vmul.f32 0.044715, %v2352_v38 }
 0x71b   : > { %v2364_v46 = vmul.f32 0.5, %v2352_v38 }
 0x71c   : > { %v2385_v17 = vmul.f32 0.7978846, %v2381_v26  ;;  %v2378_v30 = vmul.f32 %v2374_v44, %v2360_v63  ;;  %v2379_v48 = vadd.f32 %v2375_v43, %v2349_v19  ;;  %v2372_v36 = vmul.f32 %v2368_v42, %v2352_v38 }
 0x71e   : > { %v2382_v3 = vadd.f32 %v2378_v30, %v2360_v63  ;;  %v2383_v22 = vmul.f32 0.7978846, %v2379_v48  ;;  %v2376_v49 = vmul.f32 %v2372_v36, %v2352_v38  ;;  %3667 = vtanh.f32 %v2385_v17 }
 0x720   : > { %v2386_v27 = vmul.f32 0.7978846, %v2382_v3  ;;  %v2380_v53 = vadd.f32 %v2376_v49, %v2352_v38  ;;  %3669 = vtanh.f32 %v2383_v22 }
 0x722   : > { %3671 = vtanh.f32 %v2386_v27  ;;  %v2384_v55 = vmul.f32 0.7978846, %v2380_v53 }
 0x724   : > { %3673 = vtanh.f32 %v2384_v55 }
 0x72b   : > { %v3668_v35 = vpop.eup %3667 }
 0x72c   : > { %v2393_v5 = vadd.f32 1.0, %v3668_v35 }
 0x72d   : > { %v3670_v29 = vpop.eup %3669 }
 0x72e   : > { %v2391_v40 = vadd.f32 1.0, %v3670_v29  ;;  %v2397_v37 = vmul.f32 %v2393_v5, %v2365_v6 }
 0x72f   : > { %v3672_v59 = vpop.eup %3671 }
 0x730   : > { %v2394_v60 = vadd.f32 1.0, %v3672_v59  ;;  %v2395_v39 = vmul.f32 %v2391_v40, %v2363_v25 }
 0x731   : > { %v3674_v62 = vpop.eup %3673 }
 0x732   : > { %v2392_v61 = vadd.f32 1.0, %v3674_v62  ;;  %v2398_v7 = vmul.f32 %v2394_v60, %v2366_v1 }
 0x734   : > { %v2396_v41 = vmul.f32 %v2392_v61, %v2364_v46  ;;  %v2400_v11 = vpack.c.bf16 %v2398_v7, %v2397_v37 }
 0x736   : > { %v2399_v10 = vpack.c.bf16 %v2396_v41, %v2395_v39 }
 0x738   : > { %3396 = vmatprep.mubr.bf16.mxu1 %v2399_v10 }
 0x739   : > { %3397 = vmatmul.mubr.bf16.vlgmr.msra.gmra.mxu1 %v2400_v11 }
 0x7f9   : > { %v3398_v12 = vpop.f32.mrf.mxu1 }
 0x7fa   : > { %v2515_v34 = vadd.f32 %v3398_v12, %v3146_v54 }
 0x7fb   : > { %v2506_v0 = vpop.f32.mrf.mxu1 }
 0x7fc   : > { %v5014_v13 = vadd.f32 %v2515_v34, %v4974_v51  ;;  %v2507_v16 = vadd.f32 %v3146_v54, %v2506_v0 }
 0x7fd   : > { %v3399_v58 = vpop.f32.mrf.mxu1 }
 0x7fe   : > { %2527 = vst [vmem:[#allocation2 + $0x18] sm:$0xff] %v5014_v13  ;;  %v5018_v23 = vadd.f32 %v2507_v16, %v4962_v45  ;;  %v2518_v33 = vadd.f32 %v3399_v58, %v3146_v54 }
 0x7ff   : > { %v2509_v24 = vpop.f32.mrf.mxu1 }
 0x800   : > { %2525 = vst [vmem:[#allocation2 + $0x10] sm:$0xff] %v5018_v23  ;;  %v5022_v9 = vadd.f32 %v2518_v33, %v4978_v57  ;;  %v2510_v2 = vadd.f32 %v3146_v54, %v2509_v24  ;;  %2532 = sbr.rel (%p3155_p5) target bundleno = 2465 (0x9a1), region = 156 }
 0x802   : > { %2528 = vst [vmem:[#allocation2 + $0x8] sm:$0xff] %v5022_v9  ;;  %v5026_v51 = vadd.f32 %v2510_v2, %v4968_v8 }
 0x804   : > { %2526 = vst [vmem:[#allocation2] sm:$0xff] %v5026_v51 }
 0x805   : > { %2541 = vadd.xlane.f32.xlu1 %v5014_v13  ;;  %2537 = vadd.xlane.f32.xlu0 %v5018_v23  ;;  %v2560_v45 = vmul.f32 %v5026_v51, %v5026_v51  ;;  %v2559_v8 = vmul.f32 %v5018_v23, %v5018_v23  ;;  %v2562_v57 = vmul.f32 %v5022_v9, %v5022_v9  ;;  %v3679_v21 = vld [vmem:[#allocation23 + $0x38] sm:$0xff]   ;;  %v4170_v15 = vmov 0.0   ;;  %v3680_v50 = vld [vmem:[#allocation23 + $0x30] sm:$0xff]   ;;  %v3681_v31 = vld [vmem:[#allocation23 + $0x28] sm:$0xff]  }
 0x806   : > { %v2561_v14 = vmul.f32 %v5014_v13, %v5014_v13  ;;  %3400 = vmatprep.subr.bf16.mxu0 %v4170_v15  ;;  %vm4171_vm3 = vmmov 0   ;;  %v3682_v47 = vld [vmem:[#allocation23 + $0x20] sm:$0xff]   ;;  %v3683_v19 = vld [vmem:[#allocation23 + $0x18] sm:$0xff]   ;;  %v3684_v4 = vld [vmem:[#allocation23 + $0x10] sm:$0xff]   ;;  %vm2659_vm4 = vcmask 1041409  }
 0x807   : > { %3416 = vmatprep.mubr.msk.bf16.mxu0 %vm4171_vm3, %v4170_v15  ;;  %3401 = vmatpush3.bf16.msra.mxu0 %v3679_v21  ;;  %v3685_v56 = vld [vmem:[#allocation23 + $0x8] sm:$0xff]   ;;  %v3686_v28 = vld [vmem:[#allocation23] sm:$0xff]  }
 0x808   : > { %3402 = vmatprep.subr.bf16.mxu0 %v4170_v15 }
 0x809   : > { %2543 = vadd.xlane.f32.xlu1 %v5022_v9  ;;  %2539 = vadd.xlane.f32.xlu0 %v5026_v51 }
 0x80b   : > { %3403 = vmatpush3.bf16.msra.mxu0 %v3680_v50  ;;  %v2535_v50 = vld [vmem:[#allocation21] sm:$0xff] }
 0x80c   : > { %3404 = vmatprep.subr.bf16.mxu0 %v4170_v15 }
 0x80d   : > { %2565 = vadd.xlane.f32.xlu1 %v2560_v45  ;;  %2563 = vadd.xlane.f32.xlu0 %v2559_v8 }
 0x80f   : > { %3405 = vmatpush3.bf16.msra.mxu0 %v3681_v31  ;;  %v2536_v31 = vld [vmem:[#allocation21 + $0x8] sm:$0xff] }
 0x810   : > { %3406 = vmatprep.subr.bf16.mxu0 %v4170_v15 }
 0x811   : > { %2569 = vadd.xlane.f32.xlu1 %v2562_v57  ;;  %2567 = vadd.xlane.f32.xlu0 %v2561_v14  ;;  %v2533_v57 = vld [vmem:[%s5193_s12] sm:$0xff]  ;;  %v2534_v14 = vld [vmem:[%s5193_s12 + $0x8] sm:$0xff] }
 0x813   : > { %3407 = vmatpush3.bf16.msra.mxu0 %v3682_v47 }
 0x814   : > { %3408 = vmatprep.subr.bf16.mxu0 %v4170_v15 }
 0x817   : > { %3409 = vmatpush3.bf16.msra.mxu0 %v3683_v19 }
 0x818   : > { %3410 = vmatprep.subr.bf16.mxu0 %v4170_v15 }
 0x81b   : > { %3411 = vmatpush3.bf16.msra.mxu0 %v3684_v4 }
 0x81c   : > { %3412 = vmatprep.subr.bf16.mxu0 %v4170_v15 }
 0x81f   : > { %3413 = vmatpush3.bf16.msra.mxu0 %v3685_v56 }
 0x820   : > { %3414 = vmatprep.subr.bf16.mxu0 %v4170_v15 }
 0x823   : > { %3415 = vmatpush3.bf16.msra.mxu0 %v3686_v28 }
 0x88e   : > { %v2542_v63 = vpop.xlane.xlu1 %2541  ;;  %v2538_v20 = vpop.xlane.xlu0 %2537 }
 0x892   : > { %v2544_v32 = vpop.xlane.xlu1 %2543  ;;  %v2540_v52 = vpop.xlane.xlu0 %2539 }
 0x893   : > { %v2552_v18 = vadd.f32 %v2544_v32, %v2542_v63  ;;  %v2545_v38 = vadd.f32 %v2540_v52, %v2538_v20 }
 0x895   : > { %v2553_v26 = vrot.slane %v2552_v18, 4  ;;  %v2546_v43 = vrot.slane %v2545_v38, 4 }
 0x896   : > { %v2566_v44 = vpop.xlane.xlu1 %2565  ;;  %v2564_v42 = vpop.xlane.xlu0 %2563 }
 0x897   : > { %v2554_v17 = vadd.f32 %v2553_v26, %v2552_v18  ;;  %v2547_v30 = vadd.f32 %v2546_v43, %v2545_v38  ;;  %v2571_v48 = vadd.f32 %v2566_v44, %v2564_v42 }
 0x899   : > { %v2555_v36 = vrot.slane %v2554_v17, 2  ;;  %v2548_v3 = vrot.slane %v2547_v30, 2  ;;  %v2572_v22 = vrot.slane %v2571_v48, 4 }
 0x89a   : > { %v2570_v49 = vpop.xlane.xlu1 %2569  ;;  %v2568_v27 = vpop.xlane.xlu0 %2567 }
 0x89b   : > { %v2556_v53 = vadd.f32 %v2555_v36, %v2554_v17  ;;  %v2549_v55 = vadd.f32 %v2548_v3, %v2547_v30  ;;  %v2573_v35 = vadd.f32 %v2572_v22, %v2571_v48  ;;  %v2578_v29 = vadd.f32 %v2570_v49, %v2568_v27 }
 0x89d   : > { %v2550_v59 = vrot.slane %v2549_v55, 1  ;;  %v2574_v60 = vrot.slane %v2573_v35, 2  ;;  %v2579_v40 = vrot.slane %v2578_v29, 4  ;;  %v2557_v62 = vrot.slane %v2556_v53, 1 }
 0x89f   : > { %v2551_v1 = vadd.f32 %v2550_v59, %v2549_v55  ;;  %v2575_v5 = vadd.f32 %v2574_v60, %v2573_v35  ;;  %v2580_v25 = vadd.f32 %v2579_v40, %v2578_v29  ;;  %v2558_v6 = vadd.f32 %v2557_v62, %v2556_v53 }
 0x8a1   : > { %v2576_v46 = vrot.slane %v2575_v5, 1  ;;  %v2581_v61 = vrot.slane %v2580_v25, 2  ;;  %v2585_v7 = vmul.f32 0.001953125, %v2551_v1  ;;  %v2586_v37 = vmul.f32 0.001953125, %v2558_v6  ;;  %v3156_v1 = vld [vmem:[%s5194_s3] ss:$0 sm:$0xff] }
 0x8a3   : > { %v2577_v39 = vadd.f32 %v2576_v46, %v2575_v5  ;;  %v2582_v41 = vadd.f32 %v2581_v61, %v2580_v25  ;;  %v2589_v10 = vmul.f32 %v2585_v7, %v2585_v7  ;;  %v2590_v16 = vmul.f32 %v2586_v37, %v2586_v37 }
 0x8a4   : > { %v2593_v2 = vsub.f32 %v5018_v23, %v2585_v7  ;;  %v2594_v45 = vsub.f32 %v5026_v51, %v2585_v7  ;;  %v2595_v47 = vsub.f32 %v5014_v13, %v2586_v37  ;;  %v2596_v19 = vsub.f32 %v5022_v9, %v2586_v37 }
 0x8a5   : > { %v2587_v11 = vmul.f32 0.001953125, %v2577_v39  ;;  %v2583_v54 = vrot.slane %v2582_v41, 1 }
 0x8a7   : > { %v2591_v12 = vsub.f32 %v2587_v11, %v2589_v10  ;;  %v2584_v34 = vadd.f32 %v2583_v54, %v2582_v41 }
 0x8a9   : > { %v2597_v0 = vadd.f32 1e-05, %v2591_v12  ;;  %v2588_v58 = vmul.f32 0.001953125, %v2584_v34 }
 0x8ab   : > { %3687 = vrsqrt.f32 %v2597_v0  ;;  %v2592_v33 = vsub.f32 %v2588_v58, %v2590_v16 }
 0x8ad   : > { %v2598_v24 = vadd.f32 1e-05, %v2592_v33 }
 0x8af   : > { %3689 = vrsqrt.f32 %v2598_v24 }
 0x8b8   : > { %v3688_v8 = vpop.eup %3687 }
 0x8b9   : > { %v2601_v21 = vmul.f32 %v3688_v8, %v2593_v2  ;;  %v2602_v15 = vmul.f32 %v3688_v8, %v2594_v45 }
 0x8bb   : > { %v2605_v23 = vmul.f32 %v2601_v21, %v2533_v57  ;;  %v2606_v4 = vmul.f32 %v2602_v15, %v2534_v14 }
 0x8bc   : > { %v3690_v51 = vpop.eup %3689 }
 0x8bd   : > { %v2603_v56 = vmul.f32 %v3690_v51, %v2595_v47  ;;  %v2604_v28 = vmul.f32 %v3690_v51, %v2596_v19  ;;  %v2609_v63 = vadd.f32 %v2605_v23, %v2535_v50  ;;  %v2610_v20 = vadd.f32 %v2606_v4, %v2536_v31 }
 0x8bf   : > { %v2607_v32 = vmul.f32 %v2603_v56, %v2533_v57  ;;  %v2608_v52 = vmul.f32 %v2604_v28, %v2534_v14  ;;  %v2613_v18 = vadd.f32 %v2610_v20, %v2609_v63 }
 0x8c1   : > { %v2611_v38 = vadd.f32 %v2607_v32, %v2535_v50  ;;  %v2612_v26 = vadd.f32 %v2608_v52, %v2536_v31  ;;  %v2614_v43 = vrot.slane %v2613_v18, 4 }
 0x8c3   : > { %v2615_v44 = vadd.f32 %v2614_v43, %v2613_v18  ;;  %v2620_v42 = vadd.f32 %v2612_v26, %v2611_v38 }
 0x8c5   : > { %v2616_v17 = vrot.slane %v2615_v44, 2  ;;  %v2621_v30 = vrot.slane %v2620_v42, 4 }
 0x8c7   : > { %v2617_v13 = vadd.f32 %v2616_v17, %v2615_v44  ;;  %v2622_v48 = vadd.f32 %v2621_v30, %v2620_v42 }
 0x8c9   : > { %v2618_v9 = vrot.slane %v2617_v13, 1  ;;  %v2623_v36 = vrot.slane %v2622_v48, 2 }
 0x8cb   : > { %v2619_v3 = vadd.f32 %v2618_v9, %v2617_v13  ;;  %v2624_v22 = vadd.f32 %v2623_v36, %v2622_v48 }
 0x8cd   : > { %v2625_v49 = vrot.slane %v2624_v22, 1  ;;  %v2628_v27 = vmul.f32 0.0625, %v2619_v3 }
 0x8cf   : > { %v2626_v53 = vadd.f32 %v2625_v49, %v2624_v22  ;;  %v2630_v35 = vpack.c.bf16 %v2628_v27, %v2628_v27 }
 0x8d1   : > { %v2629_v55 = vmul.f32 0.0625, %v2626_v53  ;;  %v2657_v59 = vunpack.c.l.b16 %v2630_v35 }
 0x8d3   : > { %v2631_v29 = vpack.c.bf16 %v2629_v55, %v2629_v55 }
 0x8d5   : > { %v2658_v60 = vunpack.c.l.b16 %v2631_v29 }
 0x8d7   : > { %v2660_v40 = vsel %vm2659_vm4, %v2658_v60, %v2657_v59 }
 0x8d8   : > { %v2661_v62 = vpack.c.b16 %v2660_v40, %v2660_v40 }
 0x8da   : > { %3417 = vmatmul.mubr.bf16.vlgmr.msra.gmra.mxu0 %v2661_v62 }
 0x99a   : > { %v2745_v5 = vpop.f32.mrf.mxu0 }
 0x99b   : > { %v2746_v25 = vadd.f32 %v3156_v1, %v2745_v5 }
 0x99c   : > { %v3418_v46 = vpop.f32.mrf.mxu0 }
 0x99d   : > { %2751 = vst [vmem:[#allocation24] sm:$0x3] %v2746_v25 }
 0x99e   : > { %v2748_v61 = vpop.f32.mrf.mxu0 }
 0x9a0   : > { %v3419_v6 = vpop.f32.mrf.mxu0 }
 0x9a1 PF: > { %s5195_s23 = sld [smem:[#allocation37_spill]]  ;;  %s4172_s22 = smov [#allocation24]  }
 0x9a2   : > { %s2761_s16 = sshll.u32 %s4172_s22, 4  ;;  %s2762_s16 = int_to_ptr.vmem [resolvable:$true] %s2761_s16 }
 0x9a3   : > { %s4049_s28 = scalar_lea.vmem %s2762_s16, 32  ;;  %p4056_p6 = scmp.lt.s32.totalorder %s2762_s16, %s2762_s16 }
 0x9a4   : > { %p4050_p4 = scmp.ne.s32.totalorder %s2762_s16, %s4049_s28  ;;  %p4057_p13 = scmp.lt.s32.totalorder %s4049_s28, %s4049_s28 }
 0x9a6   : > { %p4058_p10 = por %p4057_p13, %p4056_p6 }
 0x9a7   : > { %p3504_p7 = scmp.eq.s32.totalorder %s5195_s23, 1 }
 0x9a9   : > { %p4051_p9 = pnand %p4050_p4, %p3504_p7 }
 0x9ab   : > { %p4052_p3 = pneg %p4051_p9 }
 0x9ad   : > { %p4059_p0 = pnand %p4058_p10, %p4052_p3 }
 0x9af   : > { %4062 = shalt.err (!%p4059_p0)
}
 0x9b0   : > { %s5196_s25 = sld [smem:[#allocation56_spill]] }
 0x9b6   : > { %3453 = dma.vmem_to_hbm [thread:$0]  (%p3504_p7), %s2762_s16, 32, %s5196_s25, [#allocation5]  }
 0x9b7   : > { %4126 = dma.done.wait (%p3504_p7), [#allocation5], 32  }
 0x9b8   : > { %4128 = vsyncadd (%p3504_p7), [#allocation5], 4294967264 }
 0x9b9 PF: > { %s5197_s21 = sld [smem:[#allocation36_spill]] }
 0x9ba   : > { %s5198_s0 = sld [smem:[#allocation33_spill]] }
 0x9bb   : > { %s5199_s30 = sld [smem:[#allocation34_spill]] }
 0x9bc   : > { %s5200_s20 = sld [smem:[#allocation41_spill]] }
 0x9bd   : > { %s5201_s26 = sld [smem:[#allocation40_spill]] }
 0x9bf   : > { %s47_s22 = sadd.s32 1, %s5197_s21   ;;  %s5202_s21 = smov %s4147_s1 }
 0x9c0   : > { %p44_p12 = scmp.ge.s32.totalorder %s47_s22, 4  }
 0x9c2   :  { %46 = sbr.rel (!%p44_p12) target bundleno = 31 (0x1f), region = 269 }
 0x9c3   : > { %s5203_s1 = smov %s5201_s26 }
 0x9c7   :  { %2774 = vsyncpa [#allocation4], 1 }
 0x9c8   :  { %2776 = vsyncpa [#allocation4 + $0x1], 1 }
 0x9c9   :  { %2777 = vsyncpa [#allocation7], 1 }
 0x9ca   :  { %2779 = vsyncpa [#allocation7 + $0x1], 1 }
 0x9cb   :  { %2780 = vsyncpa [#allocation10], 1 }
 0x9cc   :  { %2782 = vsyncpa [#allocation10 + $0x1], 1 }
 0x9cd   :  { %2783 = vsyncpa [#allocation13], 1 }
 0x9ce   :  { %2785 = vsyncpa [#allocation13 + $0x1], 1 }
 0x9cf   :  { %2786 = vsyncpa [#allocation16], 1 }
 0x9d0   :  { %2788 = vsyncpa [#allocation16 + $0x1], 1 }
 0x9d1   :  { %2789 = vsyncpa [#allocation19], 1 }
 0x9d2   :  { %2791 = vsyncpa [#allocation19 + $0x1], 1 }
 0x9d3   :  { %2792 = vsyncpa [#allocation22], 1 }
 0x9d4   :  { %2793 = vsyncpa [#allocation5], 1 }
 0x9d5   :  { %2795 = vsyncpa [#allocation5 + $0x1], 1 }

</bundles_post_ra>
